<compile_context>
chip_gen: v6e
topology: v6e:2x2x1
jax: 0.10.0
libtpu: 0.0.40
codegen_flags: <defaults>
</compile_context>

<pallas_src>
import functools

import jax
import jax.numpy as jnp
from jax.experimental import pallas as pl
from jax.experimental.pallas import tpu as pltpu

_BN_EPS = 1e-5
_VMEM_LIMIT = 32 * 1024 * 1024  # tiles are small; fits v5e/v6e/v7x with ample headroom


def _round_up(x, m):
    return ((x + m - 1) // m) * m


# ------------------------------- Pallas kernels --------------------------------

def _conv_stats_kernel(p_ref, w_ref, conv_ref, stats_ref):
    """One M-tile: bf16 MXU matmul -> bf16 conv tile + f32 per-channel sum/sumsq partials."""
    acc = jnp.dot(p_ref[...], w_ref[...], preferred_element_type=jnp.float32)  # MXU, f32 acc
    conv_ref[...] = acc.astype(conv_ref.dtype)                                 # bf16 writeback
    stats_ref[0:1, :] = jnp.sum(acc, axis=0, keepdims=True)                    # sum (f32 exact)
    stats_ref[1:2, :] = jnp.sum(acc * acc, axis=0, keepdims=True)              # sum of squares


def _stats_only_kernel(p_ref, w_ref, stats_ref):
    """One M-tile: bf16 MXU matmul, emit only the per-channel sum/sumsq partials."""
    acc = jnp.dot(p_ref[...], w_ref[...], preferred_element_type=jnp.float32)
    stats_ref[0:1, :] = jnp.sum(acc, axis=0, keepdims=True)
    stats_ref[1:2, :] = jnp.sum(acc * acc, axis=0, keepdims=True)


def _bn_relu_kernel(conv_ref, scale_ref, shift_ref, o_ref):
    """One M-tile: y = conv*scale + shift (precomputed batch-stat BN affine), ReLU, bf16 out."""
    y = conv_ref[...].astype(jnp.float32) * scale_ref[...] + shift_ref[...]
    o_ref[...] = jnp.maximum(y, 0.0).astype(o_ref.dtype)


def _matmul_bn_relu_kernel(p_ref, w_ref, scale_ref, shift_ref, o_ref):
    """One M-tile: recompute the cheap matmul, fused BN affine + ReLU, bf16 out."""
    acc = jnp.dot(p_ref[...], w_ref[...], preferred_element_type=jnp.float32)
    y = acc * scale_ref[...] + shift_ref[...]
    o_ref[...] = jnp.maximum(y, 0.0).astype(o_ref.dtype)


# --------------------------------- layer wrapper --------------------------------

def _im2col_nhwc(x_nhwc, stride, padding):
    n, h, w, cin = x_nhwc.shape
    ho = (h + 2 * padding - 3) // stride + 1
    wo = (w + 2 * padding - 3) // stride + 1
    xp = jnp.pad(x_nhwc, ((0, 0), (padding, padding), (padding, padding), (0, 0)))
    cols = []
    for kh in range(3):
        for kw in range(3):
            cols.append(xp[:, kh::stride, kw::stride, :][:, :ho, :wo, :])
    patches = jnp.concatenate(cols, axis=-1)                     # (N, Ho, Wo, 9*Cin)
    return patches.reshape(n * ho * wo, 9 * cin), ho, wo


def conv3x3_bn_relu_nhwc(x_nhwc, w_oihw, gamma, beta, *, stride=2, padding=1,
                         block_m=1024):
    n = x_nhwc.shape[0]
    cout = w_oihw.shape[0]

    # Cast BEFORE im2col: halves the materialized patches tensor; MXU consumes bf16 anyway.
    patches2d, ho, wo = _im2col_nhwc(x_nhwc.astype(jnp.bfloat16), stride, padding)
    m, k = patches2d.shape

    cpad = _round_up(cout, 128)                       # lane-dense output channels (minimum)
    tm_cap = _round_up(max(block_m, 16), 16)          # bf16 sublane packing -> multiple of 16
    if m >= 32:
        # keep at least 2 grid tiles so v7x's second TensorCore always gets work
        tm_cap = min(tm_cap, _round_up(-(-m // 2), 16))
    tm = min(tm_cap, _round_up(m, 16))
    m_pad = _round_up(m, tm)
    n_tiles = m_pad // tm

    # Zero-padded rows give all-zero conv rows -> contribute exactly 0 to sum/sumsq.
    patches = jnp.pad(patches2d, ((0, m_pad - m), (0, 0)))       # bf16
    # PyTorch (Cout,Cin,kh,kw) -> (kh,kw,Cin,Cout) -> (K,Cout); zero-pad Cout -> Cpad.
    w2d = jnp.transpose(w_oihw, (2, 3, 1, 0)).reshape(k, cout).astype(jnp.float32)
    w2d = jnp.pad(w2d, ((0, 0), (0, cpad - cout))).astype(jnp.bfloat16)

    cparams = pltpu.CompilerParams(dimension_semantics=("parallel",),
                                   vmem_limit_bytes=_VMEM_LIMIT)

    p_spec = pl.BlockSpec((tm, k), lambda i: (i, 0))
    w_spec = pl.BlockSpec((k, cpad), lambda i: (0, 0))
    stats_spec = pl.BlockSpec((8, cpad), lambda i: (i, 0))
    tile_spec = pl.BlockSpec((tm, cpad), lambda i: (i, 0))
    vec_spec = pl.BlockSpec((1, cpad), lambda i: (0, 0))

    stats_shape = jax.ShapeDtypeStruct((n_tiles * 8, cpad), jnp.float32)
    y_shape = jax.ShapeDtypeStruct((m_pad, cpad), jnp.bfloat16)

    mm_flops = 2 * m_pad * k * cpad
    mm_bytes = m_pad * k * 2 + k * cpad * 2

    # Layer-1 style fusion: when re-reading the patches (2*K B/row) is cheaper than
    # round-tripping a bf16 conv intermediate (4*Cpad B/row), skip the conv output in pass A
    # and recompute the matmul inside the fused BN/ReLU pass.
    recompute = k < 2 * cpad

    if recompute:
        stats = pl.pallas_call(
            _stats_only_kernel,
            grid=(n_tiles,),
            in_specs=[p_spec, w_spec],
            out_specs=stats_spec,
            out_shape=stats_shape,
            compiler_params=cparams,
            cost_estimate=pl.CostEstimate(
                flops=mm_flops, transcendentals=0,
                bytes_accessed=mm_bytes + n_tiles * 8 * cpad * 4),
        )(patches, w2d)
        conv = None
    else:
        conv, stats = pl.pallas_call(
            _conv_stats_kernel,
            grid=(n_tiles,),
            in_specs=[p_spec, w_spec],
            out_specs=[tile_spec, stats_spec],
            out_shape=[y_shape, stats_shape],
            compiler_params=cparams,
            cost_estimate=pl.CostEstimate(
                flops=mm_flops, transcendentals=0,
                bytes_accessed=mm_bytes + m_pad * cpad * 2 + n_tiles * 8 * cpad * 4),
        )(patches, w2d)

    # ---- tiny JAX glue: fold per-tile partials into the global batch-stat affine ----
    totals = stats.reshape(n_tiles, 8, cpad)[:, :2, :].sum(axis=0)   # (2, Cpad)
    mean = totals[0] / m                                  # true M (not the padded M)
    var = jnp.maximum(totals[1] / m - mean * mean, 0.0)   # biased variance (train mode)
    gamma_p = jnp.pad(gamma.astype(jnp.float32), (0, cpad - cout))
    beta_p = jnp.pad(beta.astype(jnp.float32), (0, cpad - cout))
    scale = (gamma_p * jax.lax.rsqrt(var + _BN_EPS)).reshape(1, cpad)
    shift = beta_p.reshape(1, cpad) - mean.reshape(1, cpad) * scale

    if recompute:
        y = pl.pallas_call(
            _matmul_bn_relu_kernel,
            grid=(n_tiles,),
            in_specs=[p_spec, w_spec, vec_spec, vec_spec],
            out_specs=tile_spec,
            out_shape=y_shape,
            compiler_params=cparams,
            cost_estimate=pl.CostEstimate(
                flops=mm_flops + 2 * m_pad * cpad, transcendentals=0,
                bytes_accessed=mm_bytes + 2 * cpad * 4 + m_pad * cpad * 2),
        )(patches, w2d, scale, shift)
    else:
        y = pl.pallas_call(
            _bn_relu_kernel,
            grid=(n_tiles,),
            in_specs=[tile_spec, vec_spec, vec_spec],
            out_specs=tile_spec,
            out_shape=y_shape,
            compiler_params=cparams,
            cost_estimate=pl.CostEstimate(
                flops=2 * m_pad * cpad, transcendentals=0,
                bytes_accessed=m_pad * cpad * 4 + 2 * cpad * 4),
        )(conv, scale, shift)

    # bf16 NHWC activation for the next layer (f32/NCHW only at the D_i interface).
    return y[:m, :cout].reshape(n, ho, wo, cout)


# ---------------------------------- module API -----------------------------------

def init_conv_stream_params(key, in_chans=4, out_chans=(48, 96, 192)):
    chans = [in_chans] + list(out_chans)
    params = []
    for i in range(len(chans) - 1):
        cin, cout = chans[i], chans[i + 1]
        key, k_w, k_g, k_b = jax.random.split(key, 4)
        fan_in = cin * 9
        w = jax.random.normal(k_w, (cout, cin, 3, 3), jnp.float32) * (2.0 / fan_in) ** 0.5
        gamma = 1.0 + 0.1 * jax.random.normal(k_g, (cout,), jnp.float32)
        beta = 0.1 * jax.random.normal(k_b, (cout,), jnp.float32)
        params.append({"w": w, "gamma": gamma, "beta": beta})
    return params


def conv_stream_forward(x_nchw, params, *, block_m=1024):
    out_dict = {"D0": x_nchw}
    # NHWC once for the whole stack; inter-layer activations stay NHWC bf16.
    x = jnp.transpose(x_nchw, (0, 2, 3, 1))
    for i, p in enumerate(params):
        x = conv3x3_bn_relu_nhwc(x, p["w"], p["gamma"], p["beta"], block_m=block_m)
        # NCHW / f32 only at the returned PyTorch-style interface tensors.
        out_dict["D" + str(i + 1)] = jnp.transpose(x, (0, 3, 1, 2)).astype(jnp.float32)
    return out_dict


# --------------------------------- pure-JAX reference -----------------------------

def _reference_layer(x_nchw, w, gamma, beta):
    y = jax.lax.conv_general_dilated(
        x_nchw.astype(jnp.float32), w.astype(jnp.float32),
        window_strides=(2, 2), padding=((1, 1), (1, 1)),
        dimension_numbers=("NCHW", "OIHW", "NCHW"))
    mean = y.mean(axis=(0, 2, 3), keepdims=True)
    var = ((y - mean) ** 2).mean(axis=(0, 2, 3), keepdims=True)
    y = (y - mean) / jnp.sqrt(var + _BN_EPS) * gamma.reshape(1, -1, 1, 1) + beta.reshape(1, -1, 1, 1)
    return jnp.maximum(y, 0.0)


def _reference_forward(x_nchw, params):
    out_dict = {"D0": x_nchw}
    x = x_nchw
    for i, p in enumerate(params):
        x = _reference_layer(x, p["w"], p["gamma"], p["beta"])
        out_dict["D" + str(i + 1)] = x
    return out_dict


if __name__ == "__main__":
    key = jax.random.PRNGKey(0)
    k_x, k_p = jax.random.split(key)
    # Small shapes consistent with the module: N=2, in_chans=4, 16x16 spatial.
    x = jax.random.normal(k_x, (2, 4, 16, 16), jnp.float32)
    params = init_conv_stream_params(k_p, in_chans=4, out_chans=(48, 96, 192))

    # Default block_m: layers 1 and 2 still produce 2 tiles (multi-tile stats reduction path).
    fwd = jax.jit(functools.partial(conv_stream_forward, block_m=1024))
    outs = fwd(x, params)
    outs = jax.tree_util.tree_map(jax.block_until_ready, outs)

    expected_shapes = {"D0": (2, 4, 16, 16), "D1": (2, 48, 8, 8),
                       "D2": (2, 96, 4, 4), "D3": (2, 192, 2, 2)}
    for name, shp in expected_shapes.items():
        assert outs[name].shape == shp, (name, outs[name].shape, shp)

    ref = _reference_forward(x, params)
    # bf16 MXU inputs + bf16 inter-layer activations (f32 accumulation / BN math):
    # ~1-2% worst-case relative deviation by layer 3.
    for name in expected_shapes:
        assert jnp.allclose(outs[name], ref[name], atol=5e-2, rtol=5e-2), name

    print("KERNEL_OK")
</pallas_src>

<mosaic_0001>
module attributes {stable_mosaic.version = 11 : i64} {
  func.func @_stats_only_kernel(%arg0: i32, %arg1: memref<64x36xbf16, #tpu.memory_space<vmem>>, %arg2: memref<36x128xbf16, #tpu.memory_space<vmem>>, %arg3: memref<8x128xf32, #tpu.memory_space<vmem>>) attributes {dimension_semantics = [#tpu.dimension_semantics<parallel>], iteration_bounds = array<i64: 2>, scalar_prefetch = 0 : i64, scratch_operands = 0 : i64, tpu.core_type = #tpu.core_type<tc>, window_params = [{transform_indices = @transform_0, window_bounds = array<i64: 64, 36>}, {pipeline_mode = #tpu.pipeline_mode<synchronous>, transform_indices = @transform_1, window_bounds = array<i64: 36, 128>}, {transform_indices = @transform_2, window_bounds = array<i64: 8, 128>}]} {
    %c0 = arith.constant 0 : index
    %c0_0 = arith.constant 0 : index
    %0 = vector.load %arg1[%c0, %c0_0] : memref<64x36xbf16, #tpu.memory_space<vmem>>, vector<64x36xbf16>
    %c0_1 = arith.constant 0 : index
    %c0_2 = arith.constant 0 : index
    %1 = vector.load %arg2[%c0_1, %c0_2] : memref<36x128xbf16, #tpu.memory_space<vmem>>, vector<36x128xbf16>
    %cst = arith.constant dense<0.000000e+00> : vector<64x128xf32>
    %2 = tpu.matmul %0, %1, %cst {dimension_numbers = #tpu.dot_dimension_numbers<[1], [0], [0], [1], [0, 0, 1, 1], [], []>} : vector<64x36xbf16>, vector<36x128xbf16>, vector<64x128xf32> -> vector<64x128xf32>
    %cst_3 = arith.constant dense<0.000000e+00> : vector<128xf32>
    %3 = vector.multi_reduction <add>, %2, %cst_3 [0] : vector<64x128xf32> to vector<128xf32>
    %4 = vector.shape_cast %3 : vector<128xf32> to vector<1x128xf32>
    %c0_4 = arith.constant 0 : index
    %c0_5 = arith.constant 0 : index
    %5 = vector.load %arg3[%c0_4, %c0_5] : memref<8x128xf32, #tpu.memory_space<vmem>>, vector<1x128xf32>
    tpu.vector_store %arg3[%c0_4, %c0_5], %4 {strides = array<i32>} : memref<8x128xf32, #tpu.memory_space<vmem>>, vector<1x128xf32>,
    %6 = arith.mulf %2, %2 : vector<64x128xf32>
    %cst_6 = arith.constant dense<0.000000e+00> : vector<128xf32>
    %7 = vector.multi_reduction <add>, %6, %cst_6 [0] : vector<64x128xf32> to vector<128xf32>
    %8 = vector.shape_cast %7 : vector<128xf32> to vector<1x128xf32>
    %c1 = arith.constant 1 : index
    %c0_7 = arith.constant 0 : index
    %9 = vector.load %arg3[%c1, %c0_7] : memref<8x128xf32, #tpu.memory_space<vmem>>, vector<1x128xf32>
    tpu.vector_store %arg3[%c1, %c0_7], %8 {strides = array<i32>} : memref<8x128xf32, #tpu.memory_space<vmem>>, vector<1x128xf32>,
    return
  }
  func.func @transform_0(%arg0: i32) -> (i32, i32) {
    %c0_i32 = arith.constant 0 : i32
    %c0_i32_0 = arith.constant 0 : i32
    return %arg0, %c0_i32 : i32, i32
  }
  func.func @transform_1(%arg0: i32) -> (i32, i32) {
    %c0_i32 = arith.constant 0 : i32
    %c0_i32_0 = arith.constant 0 : i32
    %c0_i32_1 = arith.constant 0 : i32
    return %c0_i32, %c0_i32_0 : i32, i32
  }
  func.func @transform_2(%arg0: i32) -> (i32, i32) {
    %c0_i32 = arith.constant 0 : i32
    %c0_i32_0 = arith.constant 0 : i32
    return %arg0, %c0_i32 : i32, i32
  }
}

module attributes {stable_mosaic.version = 11 : i64} {
  func.func @_matmul_bn_relu_kernel(%arg0: i32, %arg1: memref<64x36xbf16, #tpu.memory_space<vmem>>, %arg2: memref<36x128xbf16, #tpu.memory_space<vmem>>, %arg3: memref<1x128xf32, #tpu.memory_space<vmem>>, %arg4: memref<1x128xf32, #tpu.memory_space<vmem>>, %arg5: memref<64x128xbf16, #tpu.memory_space<vmem>>) attributes {dimension_semantics = [#tpu.dimension_semantics<parallel>], iteration_bounds = array<i64: 2>, scalar_prefetch = 0 : i64, scratch_operands = 0 : i64, tpu.core_type = #tpu.core_type<tc>, window_params = [{transform_indices = @transform_0, window_bounds = array<i64: 64, 36>}, {pipeline_mode = #tpu.pipeline_mode<synchronous>, transform_indices = @transform_1, window_bounds = array<i64: 36, 128>}, {pipeline_mode = #tpu.pipeline_mode<synchronous>, transform_indices = @transform_2, window_bounds = array<i64: 1, 128>}, {pipeline_mode = #tpu.pipeline_mode<synchronous>, transform_indices = @transform_3, window_bounds = array<i64: 1, 128>}, {transform_indices = @transform_4, window_bounds = array<i64: 64, 128>}]} {
    %c0 = arith.constant 0 : index
    %c0_0 = arith.constant 0 : index
    %0 = vector.load %arg1[%c0, %c0_0] : memref<64x36xbf16, #tpu.memory_space<vmem>>, vector<64x36xbf16>
    %c0_1 = arith.constant 0 : index
    %c0_2 = arith.constant 0 : index
    %1 = vector.load %arg2[%c0_1, %c0_2] : memref<36x128xbf16, #tpu.memory_space<vmem>>, vector<36x128xbf16>
    %cst = arith.constant dense<0.000000e+00> : vector<64x128xf32>
    %2 = tpu.matmul %0, %1, %cst {dimension_numbers = #tpu.dot_dimension_numbers<[1], [0], [0], [1], [0, 0, 1, 1], [], []>} : vector<64x36xbf16>, vector<36x128xbf16>, vector<64x128xf32> -> vector<64x128xf32>
    %c0_3 = arith.constant 0 : index
    %c0_4 = arith.constant 0 : index
    %3 = vector.load %arg3[%c0_3, %c0_4] : memref<1x128xf32, #tpu.memory_space<vmem>>, vector<1x128xf32>
    %4 = vector.broadcast %3 : vector<1x128xf32> to vector<64x128xf32>
    %5 = arith.mulf %2, %4 : vector<64x128xf32>
    %c0_5 = arith.constant 0 : index
    %c0_6 = arith.constant 0 : index
    %6 = vector.load %arg4[%c0_5, %c0_6] : memref<1x128xf32, #tpu.memory_space<vmem>>, vector<1x128xf32>
    %7 = vector.broadcast %6 : vector<1x128xf32> to vector<64x128xf32>
    %8 = arith.addf %5, %7 : vector<64x128xf32>
    %cst_7 = arith.constant 0.000000e+00 : f32
    %9 = vector.broadcast %cst_7 : f32 to vector<64x128xf32>
    %10 = arith.maximumf %8, %9 : vector<64x128xf32>
    %11 = arith.truncf %10 : vector<64x128xf32> to vector<64x128xbf16>
    %c0_8 = arith.constant 0 : index
    %c0_9 = arith.constant 0 : index
    %12 = vector.load %arg5[%c0_8, %c0_9] : memref<64x128xbf16, #tpu.memory_space<vmem>>, vector<64x128xbf16>
    tpu.vector_store %arg5[%c0_8, %c0_9], %11 {strides = array<i32>} : memref<64x128xbf16, #tpu.memory_space<vmem>>, vector<64x128xbf16>,
    return
  }
  func.func @transform_0(%arg0: i32) -> (i32, i32) {
    %c0_i32 = arith.constant 0 : i32
    %c0_i32_0 = arith.constant 0 : i32
    return %arg0, %c0_i32 : i32, i32
  }
  func.func @transform_1(%arg0: i32) -> (i32, i32) {
    %c0_i32 = arith.constant 0 : i32
    %c0_i32_0 = arith.constant 0 : i32
    %c0_i32_1 = arith.constant 0 : i32
    return %c0_i32, %c0_i32_0 : i32, i32
  }
  func.func @transform_2(%arg0: i32) -> (i32, i32) {
    %c0_i32 = arith.constant 0 : i32
    %c0_i32_0 = arith.constant 0 : i32
    %c0_i32_1 = arith.constant 0 : i32
    return %c0_i32, %c0_i32_0 : i32, i32
  }
  func.func @transform_3(%arg0: i32) -> (i32, i32) {
    %c0_i32 = arith.constant 0 : i32
    %c0_i32_0 = arith.constant 0 : i32
    %c0_i32_1 = arith.constant 0 : i32
    return %c0_i32, %c0_i32_0 : i32, i32
  }
  func.func @transform_4(%arg0: i32) -> (i32, i32) {
    %c0_i32 = arith.constant 0 : i32
    %c0_i32_0 = arith.constant 0 : i32
    return %arg0, %c0_i32 : i32, i32
  }
}

module attributes {stable_mosaic.version = 11 : i64} {
  func.func @_conv_stats_kernel(%arg0: i32, %arg1: memref<16x432xbf16, #tpu.memory_space<vmem>>, %arg2: memref<432x128xbf16, #tpu.memory_space<vmem>>, %arg3: memref<16x128xbf16, #tpu.memory_space<vmem>>, %arg4: memref<8x128xf32, #tpu.memory_space<vmem>>) attributes {dimension_semantics = [#tpu.dimension_semantics<parallel>], iteration_bounds = array<i64: 2>, scalar_prefetch = 0 : i64, scratch_operands = 0 : i64, tpu.core_type = #tpu.core_type<tc>, window_params = [{transform_indices = @transform_0, window_bounds = array<i64: 16, 432>}, {pipeline_mode = #tpu.pipeline_mode<synchronous>, transform_indices = @transform_1, window_bounds = array<i64: 432, 128>}, {transform_indices = @transform_2, window_bounds = array<i64: 16, 128>}, {transform_indices = @transform_3, window_bounds = array<i64: 8, 128>}]} {
    %c0 = arith.constant 0 : index
    %c0_0 = arith.constant 0 : index
    %0 = vector.load %arg1[%c0, %c0_0] : memref<16x432xbf16, #tpu.memory_space<vmem>>, vector<16x432xbf16>
    %c0_1 = arith.constant 0 : index
    %c0_2 = arith.constant 0 : index
    %1 = vector.load %arg2[%c0_1, %c0_2] : memref<432x128xbf16, #tpu.memory_space<vmem>>, vector<432x128xbf16>
    %cst = arith.constant dense<0.000000e+00> : vector<16x128xf32>
    %2 = tpu.matmul %0, %1, %cst {dimension_numbers = #tpu.dot_dimension_numbers<[1], [0], [0], [1], [0, 0, 1, 1], [], []>} : vector<16x432xbf16>, vector<432x128xbf16>, vector<16x128xf32> -> vector<16x128xf32>
    %3 = arith.truncf %2 : vector<16x128xf32> to vector<16x128xbf16>
    %c0_3 = arith.constant 0 : index
    %c0_4 = arith.constant 0 : index
    %4 = vector.load %arg3[%c0_3, %c0_4] : memref<16x128xbf16, #tpu.memory_space<vmem>>, vector<16x128xbf16>
    tpu.vector_store %arg3[%c0_3, %c0_4], %3 {strides = array<i32>} : memref<16x128xbf16, #tpu.memory_space<vmem>>, vector<16x128xbf16>,
    %cst_5 = arith.constant dense<0.000000e+00> : vector<128xf32>
    %5 = vector.multi_reduction <add>, %2, %cst_5 [0] : vector<16x128xf32> to vector<128xf32>
    %6 = vector.shape_cast %5 : vector<128xf32> to vector<1x128xf32>
    %c0_6 = arith.constant 0 : index
    %c0_7 = arith.constant 0 : index
    %7 = vector.load %arg4[%c0_6, %c0_7] : memref<8x128xf32, #tpu.memory_space<vmem>>, vector<1x128xf32>
    tpu.vector_store %arg4[%c0_6, %c0_7], %6 {strides = array<i32>} : memref<8x128xf32, #tpu.memory_space<vmem>>, vector<1x128xf32>,
    %8 = arith.mulf %2, %2 : vector<16x128xf32>
    %cst_8 = arith.constant dense<0.000000e+00> : vector<128xf32>
    %9 = vector.multi_reduction <add>, %8, %cst_8 [0] : vector<16x128xf32> to vector<128xf32>
    %10 = vector.shape_cast %9 : vector<128xf32> to vector<1x128xf32>
    %c1 = arith.constant 1 : index
    %c0_9 = arith.constant 0 : index
    %11 = vector.load %arg4[%c1, %c0_9] : memref<8x128xf32, #tpu.memory_space<vmem>>, vector<1x128xf32>
    tpu.vector_store %arg4[%c1, %c0_9], %10 {strides = array<i32>} : memref<8x128xf32, #tpu.memory_space<vmem>>, vector<1x128xf32>,
    return
  }
  func.func @transform_0(%arg0: i32) -> (i32, i32) {
    %c0_i32 = arith.constant 0 : i32
    %c0_i32_0 = arith.constant 0 : i32
    return %arg0, %c0_i32 : i32, i32
  }
  func.func @transform_1(%arg0: i32) -> (i32, i32) {
    %c0_i32 = arith.constant 0 : i32
    %c0_i32_0 = arith.constant 0 : i32
    %c0_i32_1 = arith.constant 0 : i32
    return %c0_i32, %c0_i32_0 : i32, i32
  }
  func.func @transform_2(%arg0: i32) -> (i32, i32) {
    %c0_i32 = arith.constant 0 : i32
    %c0_i32_0 = arith.constant 0 : i32
    return %arg0, %c0_i32 : i32, i32
  }
  func.func @transform_3(%arg0: i32) -> (i32, i32) {
    %c0_i32 = arith.constant 0 : i32
    %c0_i32_0 = arith.constant 0 : i32
    return %arg0, %c0_i32 : i32, i32
  }
}

module attributes {stable_mosaic.version = 11 : i64} {
  func.func @_bn_relu_kernel(%arg0: i32, %arg1: memref<16x128xbf16, #tpu.memory_space<vmem>>, %arg2: memref<1x128xf32, #tpu.memory_space<vmem>>, %arg3: memref<1x128xf32, #tpu.memory_space<vmem>>, %arg4: memref<16x128xbf16, #tpu.memory_space<vmem>>) attributes {dimension_semantics = [#tpu.dimension_semantics<parallel>], iteration_bounds = array<i64: 2>, scalar_prefetch = 0 : i64, scratch_operands = 0 : i64, tpu.core_type = #tpu.core_type<tc>, window_params = [{transform_indices = @transform_0, window_bounds = array<i64: 16, 128>}, {pipeline_mode = #tpu.pipeline_mode<synchronous>, transform_indices = @transform_1, window_bounds = array<i64: 1, 128>}, {pipeline_mode = #tpu.pipeline_mode<synchronous>, transform_indices = @transform_2, window_bounds = array<i64: 1, 128>}, {transform_indices = @transform_3, window_bounds = array<i64: 16, 128>}]} {
    %c0 = arith.constant 0 : index
    %c0_0 = arith.constant 0 : index
    %0 = vector.load %arg1[%c0, %c0_0] : memref<16x128xbf16, #tpu.memory_space<vmem>>, vector<16x128xbf16>
    %1 = arith.extf %0 : vector<16x128xbf16> to vector<16x128xf32>
    %c0_1 = arith.constant 0 : index
    %c0_2 = arith.constant 0 : index
    %2 = vector.load %arg2[%c0_1, %c0_2] : memref<1x128xf32, #tpu.memory_space<vmem>>, vector<1x128xf32>
    %3 = vector.broadcast %2 : vector<1x128xf32> to vector<16x128xf32>
    %4 = arith.mulf %1, %3 : vector<16x128xf32>
    %c0_3 = arith.constant 0 : index
    %c0_4 = arith.constant 0 : index
    %5 = vector.load %arg3[%c0_3, %c0_4] : memref<1x128xf32, #tpu.memory_space<vmem>>, vector<1x128xf32>
    %6 = vector.broadcast %5 : vector<1x128xf32> to vector<16x128xf32>
    %7 = arith.addf %4, %6 : vector<16x128xf32>
    %cst = arith.constant 0.000000e+00 : f32
    %8 = vector.broadcast %cst : f32 to vector<16x128xf32>
    %9 = arith.maximumf %7, %8 : vector<16x128xf32>
    %10 = arith.truncf %9 : vector<16x128xf32> to vector<16x128xbf16>
    %c0_5 = arith.constant 0 : index
    %c0_6 = arith.constant 0 : index
    %11 = vector.load %arg4[%c0_5, %c0_6] : memref<16x128xbf16, #tpu.memory_space<vmem>>, vector<16x128xbf16>
    tpu.vector_store %arg4[%c0_5, %c0_6], %10 {strides = array<i32>} : memref<16x128xbf16, #tpu.memory_space<vmem>>, vector<16x128xbf16>,
    return
  }
  func.func @transform_0(%arg0: i32) -> (i32, i32) {
    %c0_i32 = arith.constant 0 : i32
    %c0_i32_0 = arith.constant 0 : i32
    return %arg0, %c0_i32 : i32, i32
  }
  func.func @transform_1(%arg0: i32) -> (i32, i32) {
    %c0_i32 = arith.constant 0 : i32
    %c0_i32_0 = arith.constant 0 : i32
    %c0_i32_1 = arith.constant 0 : i32
    return %c0_i32, %c0_i32_0 : i32, i32
  }
  func.func @transform_2(%arg0: i32) -> (i32, i32) {
    %c0_i32 = arith.constant 0 : i32
    %c0_i32_0 = arith.constant 0 : i32
    %c0_i32_1 = arith.constant 0 : i32
    return %c0_i32, %c0_i32_0 : i32, i32
  }
  func.func @transform_3(%arg0: i32) -> (i32, i32) {
    %c0_i32 = arith.constant 0 : i32
    %c0_i32_0 = arith.constant 0 : i32
    return %arg0, %c0_i32 : i32, i32
  }
}

module attributes {stable_mosaic.version = 11 : i64} {
  func.func @_conv_stats_kernel(%arg0: i32, %arg1: memref<16x864xbf16, #tpu.memory_space<vmem>>, %arg2: memref<864x256xbf16, #tpu.memory_space<vmem>>, %arg3: memref<16x256xbf16, #tpu.memory_space<vmem>>, %arg4: memref<8x256xf32, #tpu.memory_space<vmem>>) attributes {dimension_semantics = [#tpu.dimension_semantics<parallel>], iteration_bounds = array<i64: 1>, scalar_prefetch = 0 : i64, scratch_operands = 0 : i64, tpu.core_type = #tpu.core_type<tc>, window_params = [{transform_indices = @transform_0, window_bounds = array<i64: 16, 864>}, {pipeline_mode = #tpu.pipeline_mode<synchronous>, transform_indices = @transform_1, window_bounds = array<i64: 864, 256>}, {transform_indices = @transform_2, window_bounds = array<i64: 16, 256>}, {transform_indices = @transform_3, window_bounds = array<i64: 8, 256>}]} {
    %c0 = arith.constant 0 : index
    %c0_0 = arith.constant 0 : index
    %0 = vector.load %arg1[%c0, %c0_0] : memref<16x864xbf16, #tpu.memory_space<vmem>>, vector<16x864xbf16>
    %c0_1 = arith.constant 0 : index
    %c0_2 = arith.constant 0 : index
    %1 = vector.load %arg2[%c0_1, %c0_2] : memref<864x256xbf16, #tpu.memory_space<vmem>>, vector<864x256xbf16>
    %cst = arith.constant dense<0.000000e+00> : vector<16x256xf32>
    %2 = tpu.matmul %0, %1, %cst {dimension_numbers = #tpu.dot_dimension_numbers<[1], [0], [0], [1], [0, 0, 1, 1], [], []>} : vector<16x864xbf16>, vector<864x256xbf16>, vector<16x256xf32> -> vector<16x256xf32>
    %3 = arith.truncf %2 : vector<16x256xf32> to vector<16x256xbf16>
    %c0_3 = arith.constant 0 : index
    %c0_4 = arith.constant 0 : index
    %4 = vector.load %arg3[%c0_3, %c0_4] : memref<16x256xbf16, #tpu.memory_space<vmem>>, vector<16x256xbf16>
    tpu.vector_store %arg3[%c0_3, %c0_4], %3 {strides = array<i32>} : memref<16x256xbf16, #tpu.memory_space<vmem>>, vector<16x256xbf16>,
    %cst_5 = arith.constant dense<0.000000e+00> : vector<256xf32>
    %5 = vector.multi_reduction <add>, %2, %cst_5 [0] : vector<16x256xf32> to vector<256xf32>
    %6 = vector.shape_cast %5 : vector<256xf32> to vector<1x256xf32>
    %c0_6 = arith.constant 0 : index
    %c0_7 = arith.constant 0 : index
    %7 = vector.load %arg4[%c0_6, %c0_7] : memref<8x256xf32, #tpu.memory_space<vmem>>, vector<1x256xf32>
    tpu.vector_store %arg4[%c0_6, %c0_7], %6 {strides = array<i32>} : memref<8x256xf32, #tpu.memory_space<vmem>>, vector<1x256xf32>,
    %8 = arith.mulf %2, %2 : vector<16x256xf32>
    %cst_8 = arith.constant dense<0.000000e+00> : vector<256xf32>
    %9 = vector.multi_reduction <add>, %8, %cst_8 [0] : vector<16x256xf32> to vector<256xf32>
    %10 = vector.shape_cast %9 : vector<256xf32> to vector<1x256xf32>
    %c1 = arith.constant 1 : index
    %c0_9 = arith.constant 0 : index
    %11 = vector.load %arg4[%c1, %c0_9] : memref<8x256xf32, #tpu.memory_space<vmem>>, vector<1x256xf32>
    tpu.vector_store %arg4[%c1, %c0_9], %10 {strides = array<i32>} : memref<8x256xf32, #tpu.memory_space<vmem>>, vector<1x256xf32>,
    return
  }
  func.func @transform_0(%arg0: i32) -> (i32, i32) {
    %c0_i32 = arith.constant 0 : i32
    %c0_i32_0 = arith.constant 0 : i32
    return %arg0, %c0_i32 : i32, i32
  }
  func.func @transform_1(%arg0: i32) -> (i32, i32) {
    %c0_i32 = arith.constant 0 : i32
    %c0_i32_0 = arith.constant 0 : i32
    %c0_i32_1 = arith.constant 0 : i32
    return %c0_i32, %c0_i32_0 : i32, i32
  }
  func.func @transform_2(%arg0: i32) -> (i32, i32) {
    %c0_i32 = arith.constant 0 : i32
    %c0_i32_0 = arith.constant 0 : i32
    return %arg0, %c0_i32 : i32, i32
  }
  func.func @transform_3(%arg0: i32) -> (i32, i32) {
    %c0_i32 = arith.constant 0 : i32
    %c0_i32_0 = arith.constant 0 : i32
    return %arg0, %c0_i32 : i32, i32
  }
}

module attributes {stable_mosaic.version = 11 : i64} {
  func.func @_bn_relu_kernel(%arg0: i32, %arg1: memref<16x256xbf16, #tpu.memory_space<vmem>>, %arg2: memref<1x256xf32, #tpu.memory_space<vmem>>, %arg3: memref<1x256xf32, #tpu.memory_space<vmem>>, %arg4: memref<16x256xbf16, #tpu.memory_space<vmem>>) attributes {dimension_semantics = [#tpu.dimension_semantics<parallel>], iteration_bounds = array<i64: 1>, scalar_prefetch = 0 : i64, scratch_operands = 0 : i64, tpu.core_type = #tpu.core_type<tc>, window_params = [{transform_indices = @transform_0, window_bounds = array<i64: 16, 256>}, {pipeline_mode = #tpu.pipeline_mode<synchronous>, transform_indices = @transform_1, window_bounds = array<i64: 1, 256>}, {pipeline_mode = #tpu.pipeline_mode<synchronous>, transform_indices = @transform_2, window_bounds = array<i64: 1, 256>}, {transform_indices = @transform_3, window_bounds = array<i64: 16, 256>}]} {
    %c0 = arith.constant 0 : index
    %c0_0 = arith.constant 0 : index
    %0 = vector.load %arg1[%c0, %c0_0] : memref<16x256xbf16, #tpu.memory_space<vmem>>, vector<16x256xbf16>
    %1 = arith.extf %0 : vector<16x256xbf16> to vector<16x256xf32>
    %c0_1 = arith.constant 0 : index
    %c0_2 = arith.constant 0 : index
    %2 = vector.load %arg2[%c0_1, %c0_2] : memref<1x256xf32, #tpu.memory_space<vmem>>, vector<1x256xf32>
    %3 = vector.broadcast %2 : vector<1x256xf32> to vector<16x256xf32>
    %4 = arith.mulf %1, %3 : vector<16x256xf32>
    %c0_3 = arith.constant 0 : index
    %c0_4 = arith.constant 0 : index
    %5 = vector.load %arg3[%c0_3, %c0_4] : memref<1x256xf32, #tpu.memory_space<vmem>>, vector<1x256xf32>
    %6 = vector.broadcast %5 : vector<1x256xf32> to vector<16x256xf32>
    %7 = arith.addf %4, %6 : vector<16x256xf32>
    %cst = arith.constant 0.000000e+00 : f32
    %8 = vector.broadcast %cst : f32 to vector<16x256xf32>
    %9 = arith.maximumf %7, %8 : vector<16x256xf32>
    %10 = arith.truncf %9 : vector<16x256xf32> to vector<16x256xbf16>
    %c0_5 = arith.constant 0 : index
    %c0_6 = arith.constant 0 : index
    %11 = vector.load %arg4[%c0_5, %c0_6] : memref<16x256xbf16, #tpu.memory_space<vmem>>, vector<16x256xbf16>
    tpu.vector_store %arg4[%c0_5, %c0_6], %10 {strides = array<i32>} : memref<16x256xbf16, #tpu.memory_space<vmem>>, vector<16x256xbf16>,
    return
  }
  func.func @transform_0(%arg0: i32) -> (i32, i32) {
    %c0_i32 = arith.constant 0 : i32
    %c0_i32_0 = arith.constant 0 : i32
    return %arg0, %c0_i32 : i32, i32
  }
  func.func @transform_1(%arg0: i32) -> (i32, i32) {
    %c0_i32 = arith.constant 0 : i32
    %c0_i32_0 = arith.constant 0 : i32
    %c0_i32_1 = arith.constant 0 : i32
    return %c0_i32, %c0_i32_0 : i32, i32
  }
  func.func @transform_2(%arg0: i32) -> (i32, i32) {
    %c0_i32 = arith.constant 0 : i32
    %c0_i32_0 = arith.constant 0 : i32
    %c0_i32_1 = arith.constant 0 : i32
    return %c0_i32, %c0_i32_0 : i32, i32
  }
  func.func @transform_3(%arg0: i32) -> (i32, i32) {
    %c0_i32 = arith.constant 0 : i32
    %c0_i32_0 = arith.constant 0 : i32
    return %arg0, %c0_i32 : i32, i32
  }
}

</mosaic_0001>

<bundles_post_ra>
// kernel: conv_stream_forward.6
= control target key start
LH: loop header
LB: loop body
LE: loop exit
PB: predicated region body
PF: predicated region fallthrough
CT: control target
= control target key end

     0   :  { %s452_s9 = smov 0   ;;  %s483_s0 = inlined_call_operand.vmem [shape: bf16[128,36], index: 0, kind: input, shape index: {}]   ;;  %s484_s1 = inlined_call_operand.vmem [shape: bf16[36,128], index: 1, kind: input, shape index: {}]   ;;  %s485_s2 = inlined_call_operand.vmem [shape: f32[16,128], index: 2, kind: output, shape index: {}]  }
   0x1 LB: > { %s458_s10 = sadd.s32 4294967295, %s435_s9   ;;  %p368_p0 = scmp.ge.s32.totalorder %s435_s9, 1  ;;  %s435_s9 = sphi %s452_s9, %s12_s9  }
   0x2   : > { %p113_p1 = scmp.lt.s32.totalorder %s435_s9, 3 }
   0x4   : > { %p114_p2 = pnand %p368_p0, %p113_p1 }
   0x5   : > { %s369_s15 = sshll.u32 (!%p114_p2), %s458_s10, 3  ;;  %p140_p4 = scmp.lt.s32.totalorder (!%p114_p2), %s458_s10, 1 }
   0x6   : > { %117 = sbr.rel (%p114_p2) target bundleno = 252 (0xfc), region = 28  ;;  %p135_p3 = scmp.lt.s32.totalorder (!%p114_p2), %s369_s15, 15 }
   0xb   : > { %v422_v0 = vld [vmem:[%s484_s1 + $0x10] ss:$0 sps:$4 sm:$0x33]   ;;  %vm206_vm0 = vcmask 1041408   ;;  %v423_v1 = vld [vmem:[%s484_s1 + $0x8] sm:$0xff]   ;;  %v424_v3 = vld [vmem:[%s484_s1] sm:$0xff]  }
   0xc   : > { %412 = vmatprep.subr.msk.bf16.mxu0 %vm206_vm0, %v422_v0  ;;  %v208_v2 = vsel %vm206_vm0, %v422_v0, 0  ;;  %413 = vmatprep.subr.msk.bf16.mxu1 %vm206_vm0, %v422_v0  ;;  %s487_s15 = smov (!%p135_p3, %s369_s15), 15  ;;  %vm193_vm1 = vcmask 293888   ;;  %s489_s10 = smov (!%p140_p4, %s458_s10), 1 }
   0xd   : > { %393 = vmatpush3.bf16.msra.mxu0 %v208_v2  ;;  %409 = vmatpush3.bf16.msra.mxu1 %v208_v2  ;;  %s370_s18 = sshll.u32 %s487_s15, 2  ;;  %s371_s22 = sshll.u32 %s489_s10, 3 }
   0xe   : > { %394 = vmatprep.subr.bf16.mxu0 %v423_v1  ;;  %407 = vmatprep.subr.bf16.mxu1 %v423_v1  ;;  %s138_s21 = scalar_lea.vmem %s483_s0, %s370_s18  ;;  %s143_s25 = scalar_lea.vmem %s485_s2, %s371_s22 }
   0xf   : > { %v425_v4 = vld [vmem:[%s138_s21] sm:$0xff]   ;;  %v426_v5 = vld [vmem:[%s138_s21 + $0x8] sm:$0xff]   ;;  %v427_v6 = vld [vmem:[%s138_s21 + $0x10] sm:$0xff]  }
  0x10   : > { %398 = vmatprep.mubr.msk.bf16.mxu0 %vm193_vm1, %v425_v4  ;;  %v428_v7 = vld [vmem:[%s138_s21 + $0x18] sm:$0xff]   ;;  %402 = vmatprep.mubr.msk.bf16.mxu1 %vm193_vm1, %v427_v6 }
  0x11   : > { %395 = vmatpush3.bf16.msra.mxu0 %v423_v1  ;;  %410 = vmatpush3.bf16.msra.mxu1 %v423_v1 }
  0x12   : > { %396 = vmatprep.subr.bf16.mxu0 %v424_v3  ;;  %408 = vmatprep.subr.bf16.mxu1 %v424_v3 }
  0x15   : > { %397 = vmatpush3.bf16.msra.mxu0 %v424_v3  ;;  %411 = vmatpush3.bf16.msra.mxu1 %v424_v3 }
  0x18   : > { %399 = vmatmul.mubr.msk.bf16.vlgmr.msra.gmra.mxu0 %vm193_vm1, %v426_v5  ;;  %403 = vmatmul.mubr.msk.bf16.vlgmr.msra.gmra.mxu1 %vm193_vm1, %v428_v7 }
  0xd8   : > { %v400_v8 = vpop.f32.mrf.mxu0  ;;  %v404_v9 = vpop.f32.mrf.mxu1 }
  0xd9   : > { %v291_v18 = vmul.f32 %v400_v8, %v400_v8  ;;  %v295_v31 = vmul.f32 %v404_v9, %v404_v9 }
  0xda   : > { %v244_v10 = vpop.f32.mrf.mxu0  ;;  %v260_v12 = vpop.f32.mrf.mxu1 }
  0xdb   : > { %v289_v14 = vmul.f32 %v244_v10, %v244_v10  ;;  %v293_v25 = vmul.f32 %v260_v12, %v260_v12 }
  0xdc   : > { %v401_v11 = vpop.f32.mrf.mxu0  ;;  %v405_v17 = vpop.f32.mrf.mxu1 }
  0xdd   : > { %v292_v21 = vmul.f32 %v401_v11, %v401_v11  ;;  %v296_v34 = vmul.f32 %v405_v17, %v405_v17 }
  0xde   : > { %v247_v13 = vpop.f32.mrf.mxu0  ;;  %v263_v24 = vpop.f32.mrf.mxu1 }
  0xdf   : > { %v275_v15 = vadd.f32 %v247_v13, %v244_v10  ;;  %v290_v16 = vmul.f32 %v247_v13, %v247_v13  ;;  %v294_v29 = vmul.f32 %v263_v24, %v263_v24 }
  0xe1   : > { %v276_v19 = vadd.f32 %v400_v8, %v275_v15  ;;  %v297_v20 = vadd.f32 %v290_v16, %v289_v14 }
  0xe3   : > { %v298_v22 = vadd.f32 %v297_v20, %v291_v18  ;;  %v277_v23 = vadd.f32 %v401_v11, %v276_v19 }
  0xe5   : > { %v278_v26 = vadd.f32 %v277_v23, %v260_v12  ;;  %v299_v27 = vadd.f32 %v298_v22, %v292_v21 }
  0xe7   : > { %v279_v28 = vadd.f32 %v278_v26, %v263_v24  ;;  %v300_v30 = vadd.f32 %v299_v27, %v293_v25 }
  0xe9   : > { %v280_v32 = vadd.f32 %v404_v9, %v279_v28  ;;  %v301_v33 = vadd.f32 %v300_v30, %v294_v29 }
  0xeb   : > { %v281_v35 = vadd.f32 %v405_v17, %v280_v32  ;;  %v302_v36 = vadd.f32 %v301_v33, %v295_v31 }
  0xed   : > { %v282_v37 = vrot.slane %v281_v35, 4  ;;  %v303_v38 = vadd.f32 %v302_v36, %v296_v34 }
  0xef   : > { %v283_v39 = vadd.f32 %v282_v37, %v281_v35  ;;  %v304_v40 = vrot.slane %v303_v38, 4 }
  0xf1   : > { %v284_v41 = vrot.slane %v283_v39, 2  ;;  %v305_v42 = vadd.f32 %v304_v40, %v303_v38 }
  0xf3   : > { %v285_v43 = vadd.f32 %v284_v41, %v283_v39  ;;  %v306_v44 = vrot.slane %v305_v42, 2 }
  0xf5   : > { %v286_v45 = vrot.slane %v285_v43, 1  ;;  %v307_v46 = vadd.f32 %v306_v44, %v305_v42 }
  0xf7   : > { %v287_v47 = vadd.f32 %v286_v45, %v285_v43  ;;  %v308_v48 = vrot.slane %v307_v46, 1 }
  0xf9   : > { %288 = vst [vmem:[%s143_s25] sm:$0x1] %v287_v47  ;;  %v309_v49 = vadd.f32 %v308_v48, %v307_v46 }
  0xfb   : > { %310 = vst [vmem:[%s143_s25 + $0x1] sm:$0x1] %v309_v49 }
  0xfc PF: > { %s12_s9 = sadd.s32 1, %s435_s9  }
  0xfd   : > { %p9_p5 = scmp.ge.s32.totalorder %s12_s9, 4  }
  0xff   :  { %11 = sbr.rel (!%p9_p5) target bundleno = 1 (0x1), region = 58 }

// kernel: conv_stream_forward.7
= control target key start
LH: loop header
LB: loop body
LE: loop exit
PB: predicated region body
PF: predicated region fallthrough
CT: control target
= control target key end

     0   :  { %s606_s15 = smov 0   ;;  %s645_s0 = inlined_call_operand.vmem [shape: bf16[128,36], index: 0, kind: input, shape index: {}]   ;;  %s646_s1 = inlined_call_operand.vmem [shape: bf16[36,128], index: 1, kind: input, shape index: {}]   ;;  %s647_s2 = inlined_call_operand.vmem [shape: f32[1,128], index: 2, kind: input, shape index: {}]   ;;  %s648_s3 = inlined_call_operand.vmem [shape: f32[1,128], index: 3, kind: input, shape index: {}]   ;;  %s649_s4 = inlined_call_operand.vmem [shape: bf16[128,128], index: 4, kind: output, shape index: {}]  }
   0x1 LB: > { %s466_s16 = sadd.s32 4294967295, %s579_s15   ;;  %p470_p0 = scmp.ge.s32.totalorder %s579_s15, 1  ;;  %s579_s15 = sphi %s606_s15, %s14_s15  }
   0x2   : > { %p163_p1 = scmp.lt.s32.totalorder %s579_s15, 3 }
   0x4   : > { %p164_p2 = pnand %p470_p0, %p163_p1 }
   0x5   : > { %s471_s21 = sshll.u32 (!%p164_p2), %s466_s16, 3 }
   0x6   : > { %167 = sbr.rel (%p164_p2) target bundleno = 232 (0xe8), region = 36  ;;  %p190_p3 = scmp.lt.s32.totalorder (!%p164_p2), %s471_s21, 15 }
   0xb   : > { %v566_v0 = vld [vmem:[%s646_s1 + $0x10] ss:$0 sps:$4 sm:$0x33]   ;;  %vm263_vm0 = vcmask 1041408   ;;  %v567_v1 = vld [vmem:[%s646_s1 + $0x8] sm:$0xff]   ;;  %v568_v3 = vld [vmem:[%s646_s1] sm:$0xff]  }
   0xc   : > { %556 = vmatprep.subr.msk.bf16.mxu0 %vm263_vm0, %v566_v0  ;;  %557 = vmatprep.subr.msk.bf16.mxu1 %vm263_vm0, %v566_v0  ;;  %v265_v2 = vsel %vm263_vm0, %v566_v0, 0  ;;  %s651_s21 = smov (!%p190_p3, %s471_s21), 15  ;;  %vm250_vm1 = vcmask 293888   ;;  %v486_v8 = vld [vmem:[%s647_s2] ss:$0 sm:$0xff] }
   0xd   : > { %537 = vmatpush3.bf16.msra.mxu0 %v265_v2  ;;  %553 = vmatpush3.bf16.msra.mxu1 %v265_v2  ;;  %s472_s24 = sshll.u32 %s651_s21, 2  ;;  %v487_v15 = vld [vmem:[%s648_s3] ss:$0 sm:$0xff] }
   0xe   : > { %538 = vmatprep.subr.bf16.mxu0 %v567_v1  ;;  %551 = vmatprep.subr.bf16.mxu1 %v567_v1  ;;  %s193_s27 = scalar_lea.vmem %s645_s0, %s472_s24  ;;  %s199_s8 = scalar_lea.vmem %s649_s4, %s472_s24 }
   0xf   : > { %v569_v4 = vld [vmem:[%s193_s27] sm:$0xff]   ;;  %v570_v5 = vld [vmem:[%s193_s27 + $0x10] sm:$0xff]   ;;  %v571_v6 = vld [vmem:[%s193_s27 + $0x8] sm:$0xff]  }
  0x10   : > { %542 = vmatprep.mubr.msk.bf16.mxu0 %vm250_vm1, %v569_v4  ;;  %546 = vmatprep.mubr.msk.bf16.mxu1 %vm250_vm1, %v570_v5  ;;  %v572_v7 = vld [vmem:[%s193_s27 + $0x18] sm:$0xff]  }
  0x11   : > { %539 = vmatpush3.bf16.msra.mxu0 %v567_v1  ;;  %554 = vmatpush3.bf16.msra.mxu1 %v567_v1 }
  0x12   : > { %540 = vmatprep.subr.bf16.mxu0 %v568_v3  ;;  %552 = vmatprep.subr.bf16.mxu1 %v568_v3 }
  0x15   : > { %541 = vmatpush3.bf16.msra.mxu0 %v568_v3  ;;  %555 = vmatpush3.bf16.msra.mxu1 %v568_v3 }
  0x18   : > { %543 = vmatmul.mubr.msk.bf16.vlgmr.msra.gmra.mxu0 %vm250_vm1, %v571_v6  ;;  %547 = vmatmul.mubr.msk.bf16.vlgmr.msra.gmra.mxu1 %vm250_vm1, %v572_v7 }
  0xd8   : > { %v544_v9 = vpop.f32.mrf.mxu0  ;;  %v548_v10 = vpop.f32.mrf.mxu1 }
  0xd9   : > { %v341_v11 = vmul.f32 %v544_v9, %v486_v8  ;;  %v345_v12 = vmul.f32 %v548_v10, %v486_v8 }
  0xda   : > { %v301_v13 = vpop.f32.mrf.mxu0  ;;  %v317_v14 = vpop.f32.mrf.mxu1 }
  0xdb   : > { %v339_v16 = vmul.f32 %v486_v8, %v301_v13  ;;  %v343_v17 = vmul.f32 %v486_v8, %v317_v14  ;;  %v356_v20 = vadd.f32 %v487_v15, %v341_v11  ;;  %v360_v21 = vadd.f32 %v487_v15, %v345_v12 }
  0xdc   : > { %v545_v18 = vpop.f32.mrf.mxu0  ;;  %v549_v19 = vpop.f32.mrf.mxu1 }
  0xdd   : > { %v342_v22 = vmul.f32 %v545_v18, %v486_v8  ;;  %v346_v23 = vmul.f32 %v549_v19, %v486_v8  ;;  %v354_v26 = vadd.f32 %v487_v15, %v339_v16  ;;  %v358_v27 = vadd.f32 %v487_v15, %v343_v17 }
  0xde   : > { %v304_v24 = vpop.f32.mrf.mxu0  ;;  %v320_v25 = vpop.f32.mrf.mxu1  ;;  %v364_v34 = vmax.f32 %v356_v20, 0.0  ;;  %v368_v35 = vmax.f32 %v360_v21, 0.0 }
  0xdf   : > { %v340_v28 = vmul.f32 %v486_v8, %v304_v24  ;;  %v344_v29 = vmul.f32 %v486_v8, %v320_v25  ;;  %v357_v30 = vadd.f32 %v487_v15, %v342_v22  ;;  %v361_v31 = vadd.f32 %v487_v15, %v346_v23 }
  0xe0   : > { %v362_v38 = vmax.f32 %v354_v26, 0.0  ;;  %v366_v39 = vmax.f32 %v358_v27, 0.0 }
  0xe1   : > { %v355_v32 = vadd.f32 %v487_v15, %v340_v28  ;;  %v359_v33 = vadd.f32 %v487_v15, %v344_v29  ;;  %v365_v36 = vmax.f32 %v357_v30, 0.0  ;;  %v369_v37 = vmax.f32 %v361_v31, 0.0 }
  0xe3   : > { %v363_v40 = vmax.f32 %v355_v32, 0.0  ;;  %v367_v41 = vmax.f32 %v359_v33, 0.0  ;;  %v514_v42 = vpack.c.bf16 %v365_v36, %v364_v34  ;;  %v524_v43 = vpack.c.bf16 %v369_v37, %v368_v35 }
  0xe5   : > { %v509_v44 = vpack.c.bf16 %v363_v40, %v362_v38  ;;  %v519_v45 = vpack.c.bf16 %v367_v41, %v366_v39  ;;  %526 = vst [vmem:[%s199_s8 + $0x8] sm:$0xff] %v514_v42   ;;  %528 = vst [vmem:[%s199_s8 + $0x18] sm:$0xff] %v524_v43  }
  0xe7   : > { %510 = vst [vmem:[%s199_s8] sm:$0xff] %v509_v44   ;;  %527 = vst [vmem:[%s199_s8 + $0x10] sm:$0xff] %v519_v45  }
  0xe8 PF: > { %s14_s15 = sadd.s32 1, %s579_s15  }
  0xe9   : > { %p11_p4 = scmp.ge.s32.totalorder %s14_s15, 4  }
  0xeb   :  { %13 = sbr.rel (!%p11_p4) target bundleno = 1 (0x1), region = 66 }

// kernel: conv_stream_forward.9
= control target key start
LH: loop header
LB: loop body
LE: loop exit
PB: predicated region body
PF: predicated region fallthrough
CT: control target
= control target key end

     0   :  { %s326_s12 = smov 0   ;;  %s343_s0 = inlined_call_operand.vmem [shape: bf16[32,128], index: 0, kind: input, shape index: {}]   ;;  %s344_s1 = inlined_call_operand.vmem [shape: f32[1,128], index: 1, kind: input, shape index: {}]   ;;  %s345_s2 = inlined_call_operand.vmem [shape: f32[1,128], index: 2, kind: input, shape index: {}]   ;;  %s346_s3 = inlined_call_operand.vmem [shape: bf16[32,128], index: 3, kind: output, shape index: {}]  }
   0x1 LB: > { %s264_s13 = sadd.s32 4294967295, %s304_s12   ;;  %p268_p0 = scmp.ge.s32.totalorder %s304_s12, 1  ;;  %s304_s12 = sphi %s326_s12, %s13_s12  }
   0x2   : > { %p138_p1 = scmp.lt.s32.totalorder %s304_s12, 3 }
   0x4   : > { %p139_p2 = pnand %p268_p0, %p138_p1 }
   0x5   : > { %s269_s14 = sshll.u32 (!%p139_p2), %s264_s13, 1 }
   0x6   : > { %142 = sbr.rel (%p139_p2) target bundleno = 26 (0x1a), region = 32  ;;  %p163_p3 = scmp.lt.s32.totalorder (!%p139_p2), %s269_s14, 3 }
   0xb   : > { %s348_s14 = smov (!%p163_p3, %s269_s14), 3  ;;  %v273_v1 = vld [vmem:[%s344_s1] ss:$0 sm:$0xff] }
   0xc   : > { %s270_s15 = sshll.u32 %s348_s14, 2  ;;  %v274_v4 = vld [vmem:[%s345_s2] ss:$0 sm:$0xff] }
   0xd   : > { %s166_s18 = scalar_lea.vmem %s343_s0, %s270_s15  ;;  %s172_s25 = scalar_lea.vmem %s346_s3, %s270_s15 }
   0xe   : > { %v282_v0 = vld [vmem:[%s166_s18] sm:$0xff]  }
   0xf   : > { %v283_v2 = vunpack.c.l.bf16 %v282_v0  ;;  %v284_v3 = vunpack.c.h.bf16 %v282_v0 }
  0x11   : > { %v185_v5 = vmul.f32 %v283_v2, %v273_v1  ;;  %v186_v6 = vmul.f32 %v284_v3, %v273_v1 }
  0x13   : > { %v194_v7 = vadd.f32 %v274_v4, %v185_v5  ;;  %v195_v8 = vadd.f32 %v274_v4, %v186_v6 }
  0x15   : > { %v196_v9 = vmax.f32 %v194_v7, 0.0  ;;  %v197_v10 = vmax.f32 %v195_v8, 0.0 }
  0x17   : > { %v288_v11 = vpack.c.bf16 %v197_v10, %v196_v9 }
  0x19   : > { %289 = vst [vmem:[%s172_s25] sm:$0xff] %v288_v11  }
  0x1a PF: > { %s13_s12 = sadd.s32 1, %s304_s12  }
  0x1b   : > { %p10_p4 = scmp.ge.s32.totalorder %s13_s12, 4  }
  0x1d   :  { %12 = sbr.rel (!%p10_p4) target bundleno = 1 (0x1), region = 62 }

// kernel: conv_stream_forward.8
= control target key start
LH: loop header
LB: loop body
LE: loop exit
PB: predicated region body
PF: predicated region fallthrough
CT: control target
= control target key end

     0   :  { %s777_s12 = smov 0   ;;  %s898_s0 = inlined_call_operand.vmem [shape: bf16[32,432], index: 0, kind: input, shape index: {}]   ;;  %s899_s1 = inlined_call_operand.vmem [shape: bf16[432,128], index: 1, kind: input, shape index: {}]   ;;  %s900_s2 = inlined_call_operand.vmem [shape: bf16[32,128], index: 2, kind: output, shape index: {0}]   ;;  %s901_s3 = inlined_call_operand.vmem [shape: f32[16,128], index: 3, kind: output, shape index: {1}]  }
   0x1 LB: > { %s783_s13 = sadd.s32 4294967295, %s754_s12   ;;  %p633_p0 = scmp.ge.s32.totalorder %s754_s12, 1  ;;  %s754_s12 = sphi %s777_s12, %s14_s12  }
   0x2   : > { %p142_p1 = scmp.lt.s32.totalorder %s754_s12, 3 }
   0x4   : > { %p143_p2 = pnand %p633_p0, %p142_p1 }
   0x5   : > { %s634_s5 = sshll.u32 (!%p143_p2), %s783_s13, 1  ;;  %p184_p4 = scmp.lt.s32.totalorder (!%p143_p2), %s783_s13, 1 }
   0x6   : > { %146 = sbr.rel (%p143_p2) target bundleno = 272 (0x110), region = 28  ;;  %p172_p3 = scmp.lt.s32.totalorder (!%p143_p2), %s634_s5, 3 }
   0xb   : > { %v715_v0 = vld [vmem:[%s899_s1 + $0xb8] sm:$0xff]   ;;  %v756_v1 = vmov 0   ;;  %v718_v4 = vld [vmem:[%s899_s1 + $0xb0] sm:$0xff]   ;;  %v721_v7 = vld [vmem:[%s899_s1 + $0xa8] sm:$0xff]   ;;  %s903_s5 = smov (!%p172_p3, %s634_s5), 3  ;;  %vm428_vm0 = vcmask 392192  }
   0xc   : > { %473 = vmatprep.subr.bf16.mxu1 %v756_v1  ;;  %v716_v2 = vld [vmem:[%s899_s1 + $0x78] sm:$0xff]   ;;  %v719_v5 = vld [vmem:[%s899_s1 + $0x70] sm:$0xff]   ;;  %v722_v8 = vld [vmem:[%s899_s1 + $0x68] sm:$0xff]   ;;  %s676_s24 = sshll.u32 %s903_s5, 4  ;;  %s905_s13 = smov (!%p184_p4, %s783_s13), 1 }
   0xd   : > { %474 = vmatpush1.bf16.msra.mxu1 %v715_v0  ;;  %v717_v3 = vld [vmem:[%s899_s1 + $0x38] sm:$0xff]   ;;  %684 = vmatprep.subr.bf16.mxu0 %v716_v2  ;;  %v720_v6 = vld [vmem:[%s899_s1 + $0x30] sm:$0xff]   ;;  %v723_v9 = vld [vmem:[%s899_s1 + $0x28] sm:$0xff]   ;;  %s176_s7 = scalar_lea.vmem %s898_s0, %s676_s24  ;;  %s638_s24 = sshll.u32 %s903_s5, 2 }
   0xe   : > { %475 = vmatprep.subr.bf16.mxu1 %v756_v1  ;;  %685 = vmatpush3.bf16.msra.mxu0 %v717_v3  ;;  %v724_v10 = vld [vmem:[%s899_s1 + $0xa0] sm:$0xff]   ;;  %v728_v13 = vld [vmem:[%s899_s1 + $0x58] sm:$0xff]   ;;  %v731_v16 = vld [vmem:[%s899_s1 + $0x50] sm:$0xff]   ;;  %s182_s27 = scalar_lea.vmem %s900_s2, %s638_s24  ;;  %s639_s5 = sshll.u32 %s905_s13, 3 }
   0xf   : > { %686 = vmatprep.subr.bf16.mxu0 %v719_v5  ;;  %v725_v11 = vld [vmem:[%s899_s1 + $0x60] sm:$0xff]   ;;  %v727_v14 = vld [vmem:[%s899_s1 + $0x98] sm:$0xff]   ;;  %v730_v17 = vld [vmem:[%s899_s1 + $0x90] sm:$0xff]   ;;  %s187_s30 = scalar_lea.vmem %s901_s3, %s639_s5 }
  0x10   : > { %v726_v12 = vld [vmem:[%s899_s1 + $0x20] sm:$0xff]   ;;  %v729_v15 = vld [vmem:[%s899_s1 + $0x18] sm:$0xff]   ;;  %v732_v18 = vld [vmem:[%s899_s1 + $0x10] sm:$0xff]  }
  0x11   : > { %476 = vmatpush1.bf16.msra.mxu1 %v718_v4  ;;  %v734_v19 = vld [vmem:[%s899_s1 + $0x48] sm:$0xff]   ;;  %v737_v22 = vld [vmem:[%s899_s1 + $0x40] sm:$0xff]   ;;  %v742_v27 = vld [vmem:[%s899_s1 + $0xd0] sm:$0xff]  }
  0x12   : > { %477 = vmatprep.subr.bf16.mxu1 %v756_v1  ;;  %687 = vmatpush3.bf16.msra.mxu0 %v720_v6  ;;  %v733_v20 = vld [vmem:[%s899_s1 + $0x88] sm:$0xff]   ;;  %v741_v23 = vld [vmem:[%s176_s7 + $0x4] ss:$16 sps:$4 sm:$0xff]   ;;  %v739_v28 = vld [vmem:[%s176_s7] ss:$16 sps:$4 sm:$0xff]  }
  0x13   : > { %688 = vmatprep.subr.bf16.mxu0 %v722_v8  ;;  %v735_v21 = vld [vmem:[%s899_s1 + $0x8] sm:$0xff]   ;;  %v736_v24 = vld [vmem:[%s899_s1 + $0x80] sm:$0xff]   ;;  %464 = vmatprep.mubr.bf16.mxu0 %v741_v23 }
  0x14   : > { %v738_v25 = vld [vmem:[%s899_s1] sm:$0xff]   ;;  %v747_v26 = vld [vmem:[%s176_s7 + $0xc] ss:$16 sps:$4 sm:$0xff]   ;;  %v745_v31 = vld [vmem:[%s176_s7 + $0x8] ss:$16 sps:$4 sm:$0xff]  }
  0x15   : > { %478 = vmatpush1.bf16.msra.mxu1 %v721_v7  ;;  %671 = vmatprep.mubr.msk.bf16.mxu1 %vm428_vm0, %v747_v26  ;;  %v743_v29 = vld [vmem:[%s899_s1 + $0xc8] sm:$0xff]   ;;  %v744_v30 = vld [vmem:[%s899_s1 + $0xc0] sm:$0xff]  }
  0x16   : > { %479 = vmatprep.subr.bf16.mxu1 %v756_v1  ;;  %689 = vmatpush3.bf16.msra.mxu0 %v723_v9 }
  0x17   : > { %690 = vmatprep.subr.bf16.mxu0 %v725_v11 }
  0x19   : > { %480 = vmatpush1.bf16.msra.mxu1 %v724_v10 }
  0x1a   : > { %481 = vmatprep.subr.bf16.mxu1 %v756_v1  ;;  %691 = vmatpush3.bf16.msra.mxu0 %v726_v12 }
  0x1b   : > { %692 = vmatprep.subr.bf16.mxu0 %v728_v13 }
  0x1d   : > { %482 = vmatpush1.bf16.msra.mxu1 %v727_v14 }
  0x1e   : > { %483 = vmatprep.subr.bf16.mxu1 %v756_v1  ;;  %693 = vmatpush3.bf16.msra.mxu0 %v729_v15 }
  0x1f   : > { %694 = vmatprep.subr.bf16.mxu0 %v731_v16 }
  0x21   : > { %484 = vmatpush1.bf16.msra.mxu1 %v730_v17 }
  0x22   : > { %485 = vmatprep.subr.bf16.mxu1 %v756_v1  ;;  %695 = vmatpush3.bf16.msra.mxu0 %v732_v18 }
  0x23   : > { %696 = vmatprep.subr.bf16.mxu0 %v734_v19 }
  0x25   : > { %486 = vmatpush1.bf16.msra.mxu1 %v733_v20 }
  0x26   : > { %487 = vmatprep.subr.bf16.mxu1 %v756_v1  ;;  %697 = vmatpush3.bf16.msra.mxu0 %v735_v21 }
  0x27   : > { %698 = vmatprep.subr.bf16.mxu0 %v737_v22 }
  0x29   : > { %488 = vmatpush1.bf16.msra.mxu1 %v736_v24 }
  0x2a   : > { %499 = vmatprep.subr.bf16.mxu1 %v756_v1  ;;  %699 = vmatpush3.bf16.msra.mxu0 %v738_v25 }
  0x2d   : > { %500 = vmatpush2.bf16.msra.mxu1 %v742_v27  ;;  %465 = vmatmul.mubr.bf16.vlgmr.msra.gmra.mxu0 %v739_v28 }
  0x2e   : > { %501 = vmatprep.subr.bf16.mxu1 %v756_v1 }
  0x31   : > { %502 = vmatpush2.bf16.msra.mxu1 %v743_v29 }
  0x32   : > { %503 = vmatprep.subr.bf16.mxu1 %v756_v1 }
  0x35   : > { %504 = vmatpush2.bf16.msra.mxu1 %v744_v30 }
  0x38   : > { %506 = vmatmul.mubr.bf16.vlgmr.msra.gmra.mxu1 %v745_v31 }
  0xed   : > { %v700_v32 = vpop.f32.mrf.mxu0 }
  0xef   : > { %v701_v33 = vpop.f32.mrf.mxu0 }
  0xf0   : > { %v702_v37 = vadd.f32 %v701_v33, %v700_v32 }
  0xf1   : > { %v703_v34 = vpop.f32.mrf.mxu0 }
  0xf3   : > { %v704_v35 = vpop.f32.mrf.mxu0 }
  0xf4   : > { %v705_v39 = vadd.f32 %v704_v35, %v703_v34 }
  0xf8   : > { %v507_v36 = vpop.f32.mrf.mxu1 }
  0xf9   : > { %v508_v40 = vadd.f32 %v702_v37, %v507_v36 }
  0xfa   : > { %v509_v38 = vpop.f32.mrf.mxu1 }
  0xfb   : > { %v532_v44 = vmul.f32 %v508_v40, %v508_v40 }
  0xfc   : > { %v510_v41 = vpop.f32.mrf.mxu1 }
  0xfd   : > { %v511_v42 = vadd.f32 %v705_v39, %v510_v41 }
  0xfe   : > { %v512_v43 = vpop.f32.mrf.mxu1 }
  0xff   : > { %v682_v45 = vpack.c.bf16 %v511_v42, %v508_v40  ;;  %v524_v46 = vadd.f32 %v511_v42, %v508_v40  ;;  %v533_v47 = vmul.f32 %v511_v42, %v511_v42 }
 0x101   : > { %683 = vst [vmem:[%s182_s27] sm:$0xff] %v682_v45   ;;  %v525_v48 = vrot.slane %v524_v46, 4  ;;  %v534_v49 = vadd.f32 %v533_v47, %v532_v44 }
 0x103   : > { %v526_v50 = vadd.f32 %v525_v48, %v524_v46  ;;  %v535_v51 = vrot.slane %v534_v49, 4 }
 0x105   : > { %v527_v52 = vrot.slane %v526_v50, 2  ;;  %v536_v53 = vadd.f32 %v535_v51, %v534_v49 }
 0x107   : > { %v528_v54 = vadd.f32 %v527_v52, %v526_v50  ;;  %v537_v55 = vrot.slane %v536_v53, 2 }
 0x109   : > { %v529_v56 = vrot.slane %v528_v54, 1  ;;  %v538_v57 = vadd.f32 %v537_v55, %v536_v53 }
 0x10b   : > { %v530_v58 = vadd.f32 %v529_v56, %v528_v54  ;;  %v539_v59 = vrot.slane %v538_v57, 1 }
 0x10d   : > { %531 = vst [vmem:[%s187_s30] sm:$0x1] %v530_v58  ;;  %v540_v60 = vadd.f32 %v539_v59, %v538_v57 }
 0x10f   : > { %541 = vst [vmem:[%s187_s30 + $0x1] sm:$0x1] %v540_v60 }
 0x110 PF: > { %s14_s12 = sadd.s32 1, %s754_s12  }
 0x111   : > { %p11_p5 = scmp.ge.s32.totalorder %s14_s12, 4  }
 0x113   :  { %13 = sbr.rel (!%p11_p5) target bundleno = 1 (0x1), region = 70 }

// kernel: conv_stream_forward.10
= control target key start
LH: loop header
LB: loop body
LE: loop exit
PB: predicated region body
PF: predicated region fallthrough
CT: control target
= control target key end

     0   :  { %vm705_vm0 = vcmask 785408   ;;  %s1654_s1 = inlined_call_operand.vmem [shape: bf16[864,256], index: 1, kind: input, shape index: {}]   ;;  %s1655_s0 = inlined_call_operand.vmem [shape: bf16[16,864], index: 0, kind: input, shape index: {}]   ;;  %s1656_s2 = inlined_call_operand.vmem [shape: bf16[16,256], index: 2, kind: output, shape index: {0}]   ;;  %s1657_s3 = inlined_call_operand.vmem [shape: f32[8,256], index: 3, kind: output, shape index: {1}]  }
   0x1   :  { %v1103_v0 = vld [vmem:[%s1654_s1 + $0x74] ss:$8 sps:$4 sm:$0xff]   ;;  %v1107_v2 = vld [vmem:[%s1654_s1 + $0x70] ss:$8 sps:$4 sm:$0xff]   ;;  %v1109_v4 = vld [vmem:[%s1654_s1 + $0x64] ss:$8 sps:$4 sm:$0xff]  }
   0x2   :  { %v1105_v1 = vld [vmem:[%s1654_s1 + $0x174] ss:$8 sps:$4 sm:$0xff]   ;;  %709 = vmatprep.subr.bf16.mxu0 %v1103_v0  ;;  %v1108_v3 = vld [vmem:[%s1654_s1 + $0x170] ss:$8 sps:$4 sm:$0xff]   ;;  %v1111_v5 = vld [vmem:[%s1654_s1 + $0x164] ss:$8 sps:$4 sm:$0xff]  }
   0x3   :  { %752 = vmatprep.subr.bf16.mxu1 %v1105_v1  ;;  %710 = vmatpush1.bf16.msra.mxu0 %v1107_v2  ;;  %v1113_v6 = vld [vmem:[%s1654_s1 + $0x60] ss:$8 sps:$4 sm:$0xff]   ;;  %v1115_v8 = vld [vmem:[%s1654_s1 + $0x54] ss:$8 sps:$4 sm:$0xff]   ;;  %v1119_v10 = vld [vmem:[%s1654_s1 + $0x50] ss:$8 sps:$4 sm:$0xff]  }
   0x4   :  { %753 = vmatpush1.bf16.msra.mxu1 %v1108_v3  ;;  %711 = vmatprep.subr.bf16.mxu0 %v1109_v4  ;;  %v1114_v7 = vld [vmem:[%s1654_s1 + $0x160] ss:$8 sps:$4 sm:$0xff]   ;;  %v1117_v9 = vld [vmem:[%s1654_s1 + $0x154] ss:$8 sps:$4 sm:$0xff]   ;;  %v1120_v11 = vld [vmem:[%s1654_s1 + $0x150] ss:$8 sps:$4 sm:$0xff]  }
   0x5   :  { %754 = vmatprep.subr.bf16.mxu1 %v1111_v5  ;;  %v1121_v12 = vld [vmem:[%s1654_s1 + $0x44] ss:$8 sps:$4 sm:$0xff]   ;;  %v1125_v14 = vld [vmem:[%s1654_s1 + $0x40] ss:$8 sps:$4 sm:$0xff]   ;;  %v1127_v16 = vld [vmem:[%s1654_s1 + $0x34] ss:$8 sps:$4 sm:$0xff]  }
   0x6   :  { %v1123_v13 = vld [vmem:[%s1654_s1 + $0x144] ss:$8 sps:$4 sm:$0xff]   ;;  %v1126_v15 = vld [vmem:[%s1654_s1 + $0x140] ss:$8 sps:$4 sm:$0xff]   ;;  %v1129_v17 = vld [vmem:[%s1654_s1 + $0x134] ss:$8 sps:$4 sm:$0xff]  }
   0x7   :  { %712 = vmatpush1.bf16.msra.mxu0 %v1113_v6  ;;  %v1131_v18 = vld [vmem:[%s1654_s1 + $0x30] ss:$8 sps:$4 sm:$0xff]   ;;  %v1133_v20 = vld [vmem:[%s1654_s1 + $0x24] ss:$8 sps:$4 sm:$0xff]   ;;  %v1137_v22 = vld [vmem:[%s1654_s1 + $0x20] ss:$8 sps:$4 sm:$0xff]  }
   0x8   :  { %755 = vmatpush1.bf16.msra.mxu1 %v1114_v7  ;;  %713 = vmatprep.subr.bf16.mxu0 %v1115_v8  ;;  %v1132_v19 = vld [vmem:[%s1654_s1 + $0x130] ss:$8 sps:$4 sm:$0xff]   ;;  %v1135_v21 = vld [vmem:[%s1654_s1 + $0x124] ss:$8 sps:$4 sm:$0xff]   ;;  %v1138_v23 = vld [vmem:[%s1654_s1 + $0x120] ss:$8 sps:$4 sm:$0xff]  }
   0x9   :  { %756 = vmatprep.subr.bf16.mxu1 %v1117_v9  ;;  %v1139_v24 = vld [vmem:[%s1654_s1 + $0x14] ss:$8 sps:$4 sm:$0xff]   ;;  %v1143_v26 = vld [vmem:[%s1654_s1 + $0x10] ss:$8 sps:$4 sm:$0xff]   ;;  %v1145_v28 = vld [vmem:[%s1654_s1 + $0x4] ss:$8 sps:$4 sm:$0xff]  }
   0xa   :  { %v1141_v25 = vld [vmem:[%s1654_s1 + $0x114] ss:$8 sps:$4 sm:$0xff]   ;;  %v1144_v27 = vld [vmem:[%s1654_s1 + $0x110] ss:$8 sps:$4 sm:$0xff]   ;;  %v1147_v29 = vld [vmem:[%s1654_s1 + $0x104] ss:$8 sps:$4 sm:$0xff]  }
   0xb   :  { %714 = vmatpush1.bf16.msra.mxu0 %v1119_v10  ;;  %v1149_v30 = vld [vmem:[%s1654_s1] ss:$8 sps:$4 sm:$0xff]   ;;  %v1151_v32 = vld [vmem:[%s1654_s1 + $0xf4] ss:$8 sps:$4 sm:$0xff]   ;;  %v1155_v34 = vld [vmem:[%s1654_s1 + $0xf0] ss:$8 sps:$4 sm:$0xff]  }
   0xc   :  { %757 = vmatpush1.bf16.msra.mxu1 %v1120_v11  ;;  %715 = vmatprep.subr.bf16.mxu0 %v1121_v12  ;;  %v1150_v31 = vld [vmem:[%s1654_s1 + $0x100] ss:$8 sps:$4 sm:$0xff]   ;;  %v1153_v33 = vld [vmem:[%s1654_s1 + $0x1f4] ss:$8 sps:$4 sm:$0xff]   ;;  %v1156_v35 = vld [vmem:[%s1654_s1 + $0x1f0] ss:$8 sps:$4 sm:$0xff]  }
   0xd   :  { %758 = vmatprep.subr.bf16.mxu1 %v1123_v13  ;;  %v1157_v36 = vld [vmem:[%s1654_s1 + $0xe4] ss:$8 sps:$4 sm:$0xff]   ;;  %v1161_v38 = vld [vmem:[%s1654_s1 + $0xe0] ss:$8 sps:$4 sm:$0xff]   ;;  %v1163_v40 = vld [vmem:[%s1654_s1 + $0xd4] ss:$8 sps:$4 sm:$0xff]  }
   0xe   :  { %v1159_v37 = vld [vmem:[%s1654_s1 + $0x1e4] ss:$8 sps:$4 sm:$0xff]   ;;  %v1162_v39 = vld [vmem:[%s1654_s1 + $0x1e0] ss:$8 sps:$4 sm:$0xff]   ;;  %v1165_v41 = vld [vmem:[%s1654_s1 + $0x1d4] ss:$8 sps:$4 sm:$0xff]  }
   0xf   :  { %716 = vmatpush1.bf16.msra.mxu0 %v1125_v14  ;;  %v1167_v42 = vld [vmem:[%s1654_s1 + $0xd0] ss:$8 sps:$4 sm:$0xff]   ;;  %v1169_v44 = vld [vmem:[%s1654_s1 + $0xc4] ss:$8 sps:$4 sm:$0xff]   ;;  %v1173_v46 = vld [vmem:[%s1654_s1 + $0xc0] ss:$8 sps:$4 sm:$0xff]  }
  0x10   :  { %759 = vmatpush1.bf16.msra.mxu1 %v1126_v15  ;;  %717 = vmatprep.subr.bf16.mxu0 %v1127_v16  ;;  %v1168_v43 = vld [vmem:[%s1654_s1 + $0x1d0] ss:$8 sps:$4 sm:$0xff]   ;;  %v1171_v45 = vld [vmem:[%s1654_s1 + $0x1c4] ss:$8 sps:$4 sm:$0xff]   ;;  %v1174_v47 = vld [vmem:[%s1654_s1 + $0x1c0] ss:$8 sps:$4 sm:$0xff]  }
  0x11   :  { %760 = vmatprep.subr.bf16.mxu1 %v1129_v17  ;;  %v1175_v48 = vld [vmem:[%s1654_s1 + $0xb4] ss:$8 sps:$4 sm:$0xff]   ;;  %v1201_v49 = vld [vmem:[%s1655_s0 + $0x4] ss:$28 sps:$4 sm:$0xff]   ;;  %v1204_v51 = vld [vmem:[%s1655_s0 + $0xc] ss:$28 sps:$4 sm:$0xff]  }
  0x12   :  { %v1177_v50 = vld [vmem:[%s1654_s1 + $0x1b4] ss:$8 sps:$4 sm:$0xff]   ;;  %741 = vmatprep.mubr.bf16.mxu0 %v1201_v49  ;;  %v1179_v52 = vld [vmem:[%s1654_s1 + $0xb0] ss:$8 sps:$4 sm:$0xff]   ;;  %784 = vmatprep.mubr.bf16.mxu1 %v1204_v51  ;;  %v1181_v54 = vld [vmem:[%s1654_s1 + $0xa4] ss:$8 sps:$4 sm:$0xff]  }
  0x13   :  { %718 = vmatpush1.bf16.msra.mxu0 %v1131_v18  ;;  %v1180_v53 = vld [vmem:[%s1654_s1 + $0x1b0] ss:$8 sps:$4 sm:$0xff]   ;;  %v1183_v55 = vld [vmem:[%s1654_s1 + $0x1a4] ss:$8 sps:$4 sm:$0xff]   ;;  %v1185_v56 = vld [vmem:[%s1654_s1 + $0xa0] ss:$8 sps:$4 sm:$0xff]  }
  0x14   :  { %761 = vmatpush1.bf16.msra.mxu1 %v1132_v19  ;;  %719 = vmatprep.subr.bf16.mxu0 %v1133_v20  ;;  %v1186_v57 = vld [vmem:[%s1654_s1 + $0x1a0] ss:$8 sps:$4 sm:$0xff]   ;;  %v1187_v58 = vld [vmem:[%s1654_s1 + $0x94] ss:$8 sps:$4 sm:$0xff]   ;;  %v1191_v60 = vld [vmem:[%s1654_s1 + $0x90] ss:$8 sps:$4 sm:$0xff]  }
  0x15   :  { %762 = vmatprep.subr.bf16.mxu1 %v1135_v21  ;;  %v1189_v59 = vld [vmem:[%s1654_s1 + $0x194] ss:$8 sps:$4 sm:$0xff]   ;;  %v1192_v61 = vld [vmem:[%s1654_s1 + $0x190] ss:$8 sps:$4 sm:$0xff]   ;;  %v1193_v62 = vld [vmem:[%s1654_s1 + $0x84] ss:$8 sps:$4 sm:$0xff]  }
  0x16   :  { %v1195_v63 = vld [vmem:[%s1654_s1 + $0x184] ss:$8 sps:$4 sm:$0xff]   ;;  %v1197_v0 = vld [vmem:[%s1654_s1 + $0x80] ss:$8 sps:$4 sm:$0xff]   ;;  %v1207_v2 = vld [vmem:[%s1654_s1 + $0x274] ss:$8 sps:$4 sm:$0xff]  }
  0x17   :  { %720 = vmatpush1.bf16.msra.mxu0 %v1137_v22  ;;  %v1198_v1 = vld [vmem:[%s1654_s1 + $0x180] ss:$8 sps:$4 sm:$0xff]   ;;  %v1237_v3 = vld [vmem:[%s1654_s1 + $0x354] ss:$8 sps:$4 sm:$0xff]   ;;  %v1205_v6 = vld [vmem:[%s1654_s1 + $0x270] ss:$8 sps:$4 sm:$0xff]  }
  0x18   :  { %763 = vmatpush1.bf16.msra.mxu1 %v1138_v23  ;;  %721 = vmatprep.subr.bf16.mxu0 %v1139_v24  ;;  %v1199_v4 = vld [vmem:[%s1655_s0] ss:$28 sps:$4 sm:$0xff]   ;;  %v1202_v5 = vld [vmem:[%s1655_s0 + $0x8] ss:$28 sps:$4 sm:$0xff]   ;;  %v1235_v8 = vld [vmem:[%s1654_s1 + $0x350] ss:$8 sps:$4 sm:$0xff]  }
  0x19   :  { %764 = vmatprep.subr.bf16.mxu1 %v1141_v25  ;;  %v1210_v7 = vld [vmem:[%s1654_s1 + $0x264] ss:$8 sps:$4 sm:$0xff]   ;;  %v1208_v10 = vld [vmem:[%s1654_s1 + $0x260] ss:$8 sps:$4 sm:$0xff]   ;;  %v1213_v11 = vld [vmem:[%s1654_s1 + $0x254] ss:$8 sps:$4 sm:$0xff]  }
  0x1a   :  { %v1243_v9 = vld [vmem:[%s1654_s1 + $0x344] ss:$8 sps:$4 sm:$0xff]   ;;  %v1241_v12 = vld [vmem:[%s1654_s1 + $0x340] ss:$8 sps:$4 sm:$0xff]   ;;  %v1249_v13 = vld [vmem:[%s1654_s1 + $0x334] ss:$8 sps:$4 sm:$0xff]  }
  0x1b   :  { %722 = vmatpush1.bf16.msra.mxu0 %v1143_v26  ;;  %v1275_v14 = vmov 0   ;;  %v1211_v15 = vld [vmem:[%s1654_s1 + $0x250] ss:$8 sps:$4 sm:$0xff]   ;;  %v1216_v16 = vld [vmem:[%s1654_s1 + $0x244] ss:$8 sps:$4 sm:$0xff]  }
  0x1c   :  { %765 = vmatpush1.bf16.msra.mxu1 %v1144_v27  ;;  %723 = vmatprep.subr.bf16.mxu0 %v1145_v28  ;;  %v1247_v17 = vld [vmem:[%s1654_s1 + $0x330] ss:$8 sps:$4 sm:$0xff]   ;;  %v1255_v18 = vld [vmem:[%s1654_s1 + $0x324] ss:$8 sps:$4 sm:$0xff]   ;;  %v1214_v19 = vld [vmem:[%s1654_s1 + $0x240] ss:$8 sps:$4 sm:$0xff]  }
  0x1d   :  { %766 = vmatprep.subr.bf16.mxu1 %v1147_v29  ;;  %v1253_v20 = vld [vmem:[%s1654_s1 + $0x320] ss:$8 sps:$4 sm:$0xff]   ;;  %v1274_v21 = vld [vmem:[%s1655_s0 + $0x14] ss:$28 sps:$4 sm:$0xff]   ;;  %v1222_v26 = vld [vmem:[%s1654_s1 + $0x224] ss:$8 sps:$4 sm:$0xff]  }
  0x1e   :  { %v1219_v22 = vld [vmem:[%s1654_s1 + $0x234] ss:$8 sps:$4 sm:$0xff]   ;;  %v1217_v24 = vld [vmem:[%s1654_s1 + $0x230] ss:$8 sps:$4 sm:$0xff]   ;;  %v1267_v27 = vld [vmem:[%s1654_s1 + $0x304] ss:$8 sps:$4 sm:$0xff]  }
  0x1f   :  { %724 = vmatpush1.bf16.msra.mxu0 %v1149_v30  ;;  %v1261_v23 = vld [vmem:[%s1654_s1 + $0x314] ss:$8 sps:$4 sm:$0xff]   ;;  %v1259_v25 = vld [vmem:[%s1654_s1 + $0x310] ss:$8 sps:$4 sm:$0xff]   ;;  %v1220_v28 = vld [vmem:[%s1654_s1 + $0x220] ss:$8 sps:$4 sm:$0xff]  }
  0x20   :  { %767 = vmatpush1.bf16.msra.mxu1 %v1150_v31  ;;  %725 = vmatprep.subr.bf16.mxu0 %v1151_v32  ;;  %v1265_v29 = vld [vmem:[%s1654_s1 + $0x300] ss:$8 sps:$4 sm:$0xff]   ;;  %v1225_v30 = vld [vmem:[%s1654_s1 + $0x214] ss:$8 sps:$4 sm:$0xff]   ;;  %v1223_v32 = vld [vmem:[%s1654_s1 + $0x210] ss:$8 sps:$4 sm:$0xff]  }
  0x21   :  { %768 = vmatprep.subr.bf16.mxu1 %v1153_v33  ;;  %v1271_v31 = vld [vmem:[%s1655_s0 + $0x18] ss:$28 sps:$4 sm:$0xff]   ;;  %v1228_v33 = vld [vmem:[%s1654_s1 + $0x204] ss:$8 sps:$4 sm:$0xff]  }
  0x22   :  { %v1270_v49 = vld [vmem:[%s1654_s1 + $0x284] ss:$8 sps:$4 sm:$0xff]  }
  0x23   :  { %726 = vmatpush2.bf16.msra.mxu0 %v1155_v34  ;;  %v1226_v34 = vld [vmem:[%s1654_s1 + $0x200] ss:$8 sps:$4 sm:$0xff]   ;;  %v1272_v51 = vld [vmem:[%s1655_s0 + $0x10] ss:$28 sps:$4 sm:$0xff]  }
  0x24   :  { %769 = vmatpush2.bf16.msra.mxu1 %v1156_v35  ;;  %727 = vmatprep.subr.bf16.mxu0 %v1157_v36  ;;  %v1231_v35 = vld [vmem:[%s1654_s1 + $0x2f4] ss:$8 sps:$4 sm:$0xff]   ;;  %v1229_v36 = vld [vmem:[%s1654_s1 + $0x2f0] ss:$8 sps:$4 sm:$0xff]  }
  0x25   :  { %770 = vmatprep.subr.bf16.mxu1 %v1159_v37  ;;  %v1234_v37 = vld [vmem:[%s1654_s1 + $0x2e4] ss:$8 sps:$4 sm:$0xff]  }
  0x27   :  { %728 = vmatpush2.bf16.msra.mxu0 %v1161_v38  ;;  %v1232_v38 = vld [vmem:[%s1654_s1 + $0x2e0] ss:$8 sps:$4 sm:$0xff]  }
  0x28   :  { %771 = vmatpush2.bf16.msra.mxu1 %v1162_v39  ;;  %729 = vmatprep.subr.bf16.mxu0 %v1163_v40  ;;  %v1240_v39 = vld [vmem:[%s1654_s1 + $0x2d4] ss:$8 sps:$4 sm:$0xff]   ;;  %v1238_v40 = vld [vmem:[%s1654_s1 + $0x2d0] ss:$8 sps:$4 sm:$0xff]  }
  0x29   :  { %772 = vmatprep.subr.bf16.mxu1 %v1165_v41  ;;  %v1246_v41 = vld [vmem:[%s1654_s1 + $0x2c4] ss:$8 sps:$4 sm:$0xff]  }
  0x2b   :  { %730 = vmatpush2.bf16.msra.mxu0 %v1167_v42  ;;  %v1244_v42 = vld [vmem:[%s1654_s1 + $0x2c0] ss:$8 sps:$4 sm:$0xff]  }
  0x2c   :  { %773 = vmatpush2.bf16.msra.mxu1 %v1168_v43  ;;  %731 = vmatprep.subr.bf16.mxu0 %v1169_v44  ;;  %v1252_v43 = vld [vmem:[%s1654_s1 + $0x2b4] ss:$8 sps:$4 sm:$0xff]   ;;  %v1250_v44 = vld [vmem:[%s1654_s1 + $0x2b0] ss:$8 sps:$4 sm:$0xff]  }
  0x2d   :  { %774 = vmatprep.subr.bf16.mxu1 %v1171_v45  ;;  %v1258_v45 = vld [vmem:[%s1654_s1 + $0x2a4] ss:$8 sps:$4 sm:$0xff]  }
  0x2f   :  { %732 = vmatpush2.bf16.msra.mxu0 %v1173_v46  ;;  %v1256_v46 = vld [vmem:[%s1654_s1 + $0x2a0] ss:$8 sps:$4 sm:$0xff]  }
  0x30   :  { %775 = vmatpush2.bf16.msra.mxu1 %v1174_v47  ;;  %733 = vmatprep.subr.bf16.mxu0 %v1175_v48  ;;  %v1264_v47 = vld [vmem:[%s1654_s1 + $0x294] ss:$8 sps:$4 sm:$0xff]   ;;  %v1262_v48 = vld [vmem:[%s1654_s1 + $0x290] ss:$8 sps:$4 sm:$0xff]  }
  0x31   :  { %776 = vmatprep.subr.bf16.mxu1 %v1177_v50  ;;  %v1268_v50 = vld [vmem:[%s1654_s1 + $0x280] ss:$8 sps:$4 sm:$0xff]  }
  0x33   :  { %734 = vmatpush2.bf16.msra.mxu0 %v1179_v52 }
  0x34   :  { %777 = vmatpush2.bf16.msra.mxu1 %v1180_v53  ;;  %735 = vmatprep.subr.bf16.mxu0 %v1181_v54 }
  0x35   :  { %778 = vmatprep.subr.bf16.mxu1 %v1183_v55 }
  0x37   :  { %736 = vmatpush2.bf16.msra.mxu0 %v1185_v56 }
  0x38   :  { %779 = vmatpush2.bf16.msra.mxu1 %v1186_v57  ;;  %737 = vmatprep.subr.bf16.mxu0 %v1187_v58 }
  0x39   :  { %780 = vmatprep.subr.bf16.mxu1 %v1189_v59 }
  0x3b   :  { %738 = vmatpush2.bf16.msra.mxu0 %v1191_v60 }
  0x3c   :  { %781 = vmatpush2.bf16.msra.mxu1 %v1192_v61  ;;  %739 = vmatprep.subr.bf16.mxu0 %v1193_v62 }
  0x3d   :  { %782 = vmatprep.subr.bf16.mxu1 %v1195_v63 }
  0x3f   :  { %740 = vmatpush2.bf16.msra.mxu0 %v1197_v0 }
  0x40   :  { %783 = vmatpush2.bf16.msra.mxu1 %v1198_v1  ;;  %795 = vmatprep.subr.bf16.mxu0 %v1207_v2 }
  0x41   :  { %842 = vmatprep.subr.bf16.mxu1 %v1237_v3 }
  0x42   :  { %742 = vmatmul.mubr.bf16.vlgmr.msra.gmra.mxu0 %v1199_v4 }
  0x43   :  { %785 = vmatmul.mubr.bf16.vlgmr.msra.gmra.mxu1 %v1202_v5  ;;  %796 = vmatpush1.bf16.msra.mxu0 %v1205_v6 }
  0x44   :  { %843 = vmatpush1.bf16.msra.mxu1 %v1235_v8  ;;  %797 = vmatprep.subr.bf16.mxu0 %v1210_v7 }
  0x45   :  { %844 = vmatprep.subr.bf16.mxu1 %v1243_v9  ;;  %870 = vmatprep.mubr.bf16.mxu1 %v1275_v14 }
  0x46   :  { %827 = vmatprep.mubr.bf16.mxu0 %v1274_v21 }
  0x47   :  { %798 = vmatpush1.bf16.msra.mxu0 %v1208_v10 }
  0x48   :  { %845 = vmatpush1.bf16.msra.mxu1 %v1241_v12  ;;  %799 = vmatprep.subr.bf16.mxu0 %v1213_v11 }
  0x49   :  { %846 = vmatprep.subr.bf16.mxu1 %v1249_v13 }
  0x4b   :  { %800 = vmatpush1.bf16.msra.mxu0 %v1211_v15 }
  0x4c   :  { %847 = vmatpush1.bf16.msra.mxu1 %v1247_v17  ;;  %801 = vmatprep.subr.bf16.mxu0 %v1216_v16 }
  0x4d   :  { %848 = vmatprep.subr.bf16.mxu1 %v1255_v18 }
  0x4f   :  { %802 = vmatpush1.bf16.msra.mxu0 %v1214_v19 }
  0x50   :  { %849 = vmatpush1.bf16.msra.mxu1 %v1253_v20  ;;  %803 = vmatprep.subr.bf16.mxu0 %v1219_v22 }
  0x51   :  { %850 = vmatprep.subr.bf16.mxu1 %v1261_v23 }
  0x53   :  { %804 = vmatpush1.bf16.msra.mxu0 %v1217_v24 }
  0x54   :  { %851 = vmatpush1.bf16.msra.mxu1 %v1259_v25  ;;  %805 = vmatprep.subr.bf16.mxu0 %v1222_v26 }
  0x55   :  { %852 = vmatprep.subr.bf16.mxu1 %v1267_v27 }
  0x57   :  { %806 = vmatpush1.bf16.msra.mxu0 %v1220_v28 }
  0x58   :  { %853 = vmatpush1.bf16.msra.mxu1 %v1265_v29  ;;  %807 = vmatprep.subr.bf16.mxu0 %v1225_v30  ;;  %v1276_v29 = vmov 1966171168  }
  0x59   :  { %v913_v30 = vunpack.c.l.s4 %v1276_v29 }
  0x5b   :  { %1095 = vmatmul.mubr.msk.bf16.vlgmr.msra.gmra.mxu1 %vm705_vm0, %v1271_v31  ;;  %808 = vmatpush1.bf16.msra.mxu0 %v1223_v32 }
  0x5c   :  { %809 = vmatprep.subr.bf16.mxu0 %v1228_v33 }
  0x5f   :  { %810 = vmatpush1.bf16.msra.mxu0 %v1226_v34 }
  0x60   :  { %811 = vmatprep.subr.bf16.mxu0 %v1231_v35  ;;  %v915_v35 = vlaneseq }
  0x62   :  { %vm929_vm1 = vcmp.lt.s32.totalorder %v915_v35, 256 }
  0x63   :  { %812 = vmatpush2.bf16.msra.mxu0 %v1229_v36 }
  0x64   :  { %813 = vmatprep.subr.bf16.mxu0 %v1234_v37 }
  0x67   :  { %814 = vmatpush2.bf16.msra.mxu0 %v1232_v38 }
  0x68   :  { %815 = vmatprep.subr.bf16.mxu0 %v1240_v39 }
  0x6b   :  { %816 = vmatpush2.bf16.msra.mxu0 %v1238_v40  ;;  %v914_v40 = vunpack.c.0.s8 %v913_v30 }
  0x6c   :  { %817 = vmatprep.subr.bf16.mxu0 %v1246_v41 }
  0x6f   :  { %818 = vmatpush2.bf16.msra.mxu0 %v1244_v42 }
  0x70   :  { %819 = vmatprep.subr.bf16.mxu0 %v1252_v43 }
  0x73   :  { %820 = vmatpush2.bf16.msra.mxu0 %v1250_v44 }
  0x74   :  { %821 = vmatprep.subr.bf16.mxu0 %v1258_v45  ;;  %v916_v45 = vshrl.u32 %v915_v35, 7 }
  0x77   :  { %822 = vmatpush2.bf16.msra.mxu0 %v1256_v46 }
  0x78   :  { %823 = vmatprep.subr.bf16.mxu0 %v1264_v47 }
  0x7b   :  { %824 = vmatpush2.bf16.msra.mxu0 %v1262_v48 }
  0x7c   :  { %825 = vmatprep.subr.bf16.mxu0 %v1270_v49 }
  0x7f   :  { %826 = vmatpush2.bf16.msra.mxu0 %v1268_v50 }
  0x82   :  { %828 = vmatmul.mubr.bf16.vlgmr.msra.gmra.mxu0 %v1272_v51 }
 0x102   :  { %v743_v53 = vpop.f32.mrf.mxu0 }
 0x103   :  { %v786_v52 = vpop.f32.mrf.mxu1 }
 0x104   :  { %v745_v55 = vpop.f32.mrf.mxu0  ;;  %v787_v61 = vadd.f32 %v786_v52, %v743_v53  ;;  %v917_v52 = vsub.s32 %v914_v40, %v916_v45 }
 0x105   :  { %v788_v54 = vpop.f32.mrf.mxu1 }
 0x106   :  { %v747_v57 = vpop.f32.mrf.mxu0  ;;  %v789_v0 = vadd.f32 %v788_v54, %v745_v55 }
 0x107   :  { %v790_v56 = vpop.f32.mrf.mxu1 }
 0x108   :  { %v749_v60 = vpop.f32.mrf.mxu0  ;;  %v791_v3 = vadd.f32 %v790_v56, %v747_v57 }
 0x109   :  { %v792_v58 = vpop.f32.mrf.mxu1 }
 0x10a   :  { %v793_v7 = vadd.f32 %v792_v58, %v749_v60 }
 0x11b   :  { %v872_v59 = vpop.f32.mrf.mxu1 }
 0x11d   :  { %v874_v62 = vpop.f32.mrf.mxu1 }
 0x11f   :  { %v876_v5 = vpop.f32.mrf.mxu1 }
 0x121   :  { %v878_v15 = vpop.f32.mrf.mxu1 }
 0x142   :  { %v829_v63 = vpop.f32.mrf.mxu0 }
 0x143   :  { %v830_v1 = vadd.f32 %v829_v63, %v787_v61 }
 0x144   :  { %v831_v2 = vpop.f32.mrf.mxu0 }
 0x145   :  { %v832_v4 = vadd.f32 %v831_v2, %v789_v0  ;;  %v873_v8 = vadd.f32 %v872_v59, %v830_v1 }
 0x146   :  { %v833_v6 = vpop.f32.mrf.mxu0 }
 0x147   :  { %v875_v9 = vadd.f32 %v874_v62, %v832_v4  ;;  %v834_v10 = vadd.f32 %v833_v6, %v791_v3  ;;  %v933_v16 = vmul.f32 %v873_v8, %v873_v8 }
 0x148   :  { %v835_v11 = vpop.f32.mrf.mxu0 }
 0x149   :  { %v1099_v12 = vpack.c.bf16 %v875_v9, %v873_v8  ;;  %v877_v13 = vadd.f32 %v876_v5, %v834_v10  ;;  %v836_v14 = vadd.f32 %v835_v11, %v793_v7  ;;  %v934_v24 = vmul.f32 %v875_v9, %v875_v9 }
 0x14b   :  { %893 = vst [vmem:[%s1656_s2] sm:$0xff] %v1099_v12  ;;  %v895_v17 = vadd.f32 %v877_v13, %v873_v8  ;;  %v935_v18 = vmul.f32 %v877_v13, %v877_v13  ;;  %v879_v19 = vadd.f32 %v878_v15, %v836_v14 }
 0x14d   :  { %v896_v20 = vrot.slane %v895_v17, 4  ;;  %v937_v21 = vadd.f32 %v935_v18, %v933_v16  ;;  %v1100_v22 = vpack.c.bf16 %v879_v19, %v877_v13  ;;  %v902_v23 = vadd.f32 %v879_v19, %v875_v9 }
 0x14e   :  { %v936_v25 = vmul.f32 %v879_v19, %v879_v19 }
 0x14f   :  { %v897_v26 = vadd.f32 %v896_v20, %v895_v17  ;;  %v938_v27 = vrot.slane %v937_v21, 4  ;;  %894 = vst [vmem:[%s1656_s2 + $0x8] sm:$0xff] %v1100_v22  ;;  %v903_v28 = vrot.slane %v902_v23, 4 }
 0x150   :  { %v944_v31 = vadd.f32 %v936_v25, %v934_v24 }
 0x151   :  { %v898_v32 = vrot.slane %v897_v26, 2  ;;  %v939_v33 = vadd.f32 %v938_v27, %v937_v21  ;;  %v904_v34 = vadd.f32 %v903_v28, %v902_v23 }
 0x152   :  { %v945_v36 = vrot.slane %v944_v31, 4 }
 0x153   :  { %v899_v37 = vadd.f32 %v898_v32, %v897_v26  ;;  %v940_v38 = vrot.slane %v939_v33, 2  ;;  %v905_v39 = vrot.slane %v904_v34, 2 }
 0x154   :  { %v946_v41 = vadd.f32 %v945_v36, %v944_v31 }
 0x155   :  { %v900_v42 = vrot.slane %v899_v37, 1  ;;  %v941_v43 = vadd.f32 %v940_v38, %v939_v33  ;;  %v906_v44 = vadd.f32 %v905_v39, %v904_v34 }
 0x156   :  { %v947_v46 = vrot.slane %v946_v41, 2 }
 0x157   :  { %v907_v47 = vrot.slane %v906_v44, 1  ;;  %v942_v48 = vrot.slane %v941_v43, 1  ;;  %v901_v50 = vadd.f32 %v900_v42, %v899_v37 }
 0x158   :  { %v948_v49 = vadd.f32 %v947_v46, %v946_v41 }
 0x159   :  { %v908_v51 = vadd.f32 %v907_v47, %v906_v44  ;;  %v943_v55 = vadd.f32 %v942_v48, %v941_v43 }
 0x15a   :  { %v949_v53 = vrot.slane %v948_v49, 1 }
 0x15b   :  { %v911_v54 = vcombine.low %v901_v50, %v908_v51 }
 0x15c   :  { %v950_v56 = vadd.f32 %v949_v53, %v948_v49 }
 0x15d   :  { %v918_v57 = vrot.slane %v911_v54, %v917_v52 }
 0x15e   :  { %v953_v58 = vcombine.low %v943_v55, %v950_v56 }
 0x15f   :  { %v925_v59 = vrot.slane %v918_v57, %v917_v52 }
 0x160   :  { %v960_v60 = vrot.slane %v953_v58, %v917_v52 }
 0x161   :  { %931 = vst.msk [vmem:[%s1657_s3] ss:$8 sm:$0x3] %vm929_vm1, %v925_v59 }
 0x162   :  { %v967_v61 = vrot.slane %v960_v60, %v917_v52 }
 0x164   :  { %1098 = vst.msk [vmem:[%s1657_s3 + $0x1] ss:$8 sm:$0x3] %vm929_vm1, %v967_v61 }

// kernel: conv_stream_forward.11
= control target key start
LH: loop header
LB: loop body
LE: loop exit
PB: predicated region body
PF: predicated region fallthrough
CT: control target
= control target key end

     0   :  { %v22_v0 = vlaneseq  ;;  %s116_s0 = inlined_call_operand.vmem [shape: bf16[16,256], index: 0, kind: input, shape index: {}]   ;;  %s117_s1 = inlined_call_operand.vmem [shape: f32[1,256], index: 1, kind: input, shape index: {}]   ;;  %s118_s2 = inlined_call_operand.vmem [shape: f32[1,256], index: 2, kind: input, shape index: {}]   ;;  %s119_s3 = inlined_call_operand.vmem [shape: bf16[16,256], index: 3, kind: output, shape index: {}]  }
   0x1   :  { %v14_v1 = vld [vmem:[%s116_s0] sm:$0xff]  ;;  %v15_v3 = vld [vmem:[%s116_s0 + $0x8] sm:$0xff] }
   0x2   :  { %v23_v2 = vshrl.u32 %v22_v0, 7  ;;  %v16_v4 = vunpack.c.l.bf16 %v14_v1  ;;  %v17_v5 = vunpack.c.h.bf16 %v14_v1  ;;  %v20_v6 = vld [vmem:[%s117_s1] sm:$0x3]  ;;  %v18_v10 = vunpack.c.l.bf16 %v15_v3 }
   0x3   :  { %v36_v7 = vld [vmem:[%s118_s2] sm:$0x3]  ;;  %v19_v11 = vunpack.c.h.bf16 %v15_v3 }
   0x4   :  { %v24_v8 = vsub.s32 0, %v23_v2  ;;  %v28_v9 = vsub.s32 1, %v23_v2 }
   0x6   :  { %v25_v12 = vrot.slane %v20_v6, %v24_v8  ;;  %v29_v13 = vrot.slane %v20_v6, %v28_v9  ;;  %v41_v14 = vrot.slane %v36_v7, %v24_v8  ;;  %v45_v15 = vrot.slane %v36_v7, %v28_v9 }
   0x8   :  { %v32_v16 = vmul.f32 %v25_v12, %v16_v4  ;;  %v33_v17 = vmul.f32 %v29_v13, %v17_v5  ;;  %v34_v18 = vmul.f32 %v25_v12, %v18_v10  ;;  %v35_v19 = vmul.f32 %v29_v13, %v19_v11 }
   0xa   :  { %v48_v20 = vadd.f32 %v41_v14, %v32_v16  ;;  %v49_v21 = vadd.f32 %v45_v15, %v33_v17  ;;  %v50_v22 = vadd.f32 %v41_v14, %v34_v18  ;;  %v51_v23 = vadd.f32 %v45_v15, %v35_v19 }
   0xc   :  { %v52_v24 = vmax.f32 %v48_v20, 0.0  ;;  %v53_v25 = vmax.f32 %v49_v21, 0.0  ;;  %v54_v26 = vmax.f32 %v50_v22, 0.0  ;;  %v55_v27 = vmax.f32 %v51_v23, 0.0 }
   0xe   :  { %v76_v28 = vpack.c.bf16 %v53_v25, %v52_v24  ;;  %v77_v29 = vpack.c.bf16 %v55_v27, %v54_v26 }
  0x10   :  { %68 = vst [vmem:[%s119_s3] sm:$0xff] %v76_v28  ;;  %69 = vst [vmem:[%s119_s3 + $0x8] sm:$0xff] %v77_v29 }

</bundles_post_ra>
